<compile_context>
chip_gen: v7x
topology: tpu7x:2x2x1
jax: 0.10.0
libtpu: 0.0.40
codegen_flags: <defaults>
</compile_context>

<pallas_src>
import math

import jax
import jax.numpy as jnp
from jax import lax
from jax.experimental import pallas as pl
from jax.experimental.pallas import tpu as pltpu

_SUBLANE = 8     # f32 sublane granule
_LANES = 128     # lane width


def _make_kernel(seq_len, batch_p, hidden, activation):
    if activation == "tanh":
        act = jnp.tanh
    else:  # 'relu' (module default)
        act = lambda z: jnp.maximum(z, 0.0)

    def kernel(x_ref, wih_ref, whh_ref, b_ref, wd_ref, bd_ref,
               out_ref, xp_scr):
        # ---- Phase 1: time-independent input projection, one MXU matmul ----
        # x_ref: (seq_len*batch_p, input) bf16, wih_ref: (input, hidden) bf16.
        # Bias (b_ih + b_hh) folded in, in f32.
        xp_scr[...] = (
            jnp.dot(x_ref[...], wih_ref[...],
                    preferred_element_type=jnp.float32)
            + b_ref[...]                      # (1, hidden) f32
        )

        # Hoist weight loads: whh stays in vregs (bf16 -> 8 vregs); the dense
        # head weight/bias loads are issued here so they hide under the
        # MXU-latency-bound recurrence instead of trailing it.
        whh = whh_ref[...]                    # (hidden, hidden) bf16
        wd = wd_ref[...]                      # (hidden, classes_p) bf16
        bd = bd_ref[...]                      # (1, classes_p) f32

        # ---- Phase 2: serial recurrence, one bf16 matmul per step -----------
        # h_0 = 0  =>  h_1 = act(xp[0])  (skip the zero matmul)
        h0 = act(xp_scr[0:batch_p, :])

        def step(t, h):
            row = pl.multiple_of(t * batch_p, batch_p)   # multiple of 8
            pre = (jnp.dot(h.astype(jnp.bfloat16), whh,
                           preferred_element_type=jnp.float32)
                   + xp_scr[pl.ds(row, batch_p), :])     # aligned (8,128) vld
            return act(pre)                              # f32 activation

        h_final = lax.fori_loop(1, seq_len, step, h0, unroll=True)

        # ---- Phase 3: dense classifier head on the final hidden state -------
        out_ref[...] = (
            jnp.dot(h_final.astype(jnp.bfloat16), wd,
                    preferred_element_type=jnp.float32)
            + bd
        )

    return kernel


def rnn_classifier_forward(x, w_ih, w_hh, b_ih, b_hh, w_dense, b_dense,
                           activation="relu"):
    """x: (seq_len, batch, input_size).  Weights in PyTorch layout:
       w_ih: (hidden, input), w_hh: (hidden, hidden), b_ih/b_hh: (hidden,),
       w_dense: (classes, hidden), b_dense: (classes,).
       Returns logits of shape (batch, classes)."""
    seq_len, batch, input_size = x.shape
    hidden = w_hh.shape[0]
    classes = w_dense.shape[0]

    # Pad batch to the 8-row sublane granule and classes to 128 lanes so every
    # in-kernel tile is sublane/lane dense (unmasked vld/vst).
    batch_p = ((batch + _SUBLANE - 1) // _SUBLANE) * _SUBLANE
    classes_p = max(_LANES, ((classes + _LANES - 1) // _LANES) * _LANES)

    x_p = jnp.zeros((seq_len, batch_p, input_size), jnp.float32)
    x_p = x_p.at[:, :batch, :].set(x.astype(jnp.float32))
    x2d = x_p.reshape(seq_len * batch_p, input_size).astype(jnp.bfloat16)

    v = jnp.transpose(w_ih).astype(jnp.bfloat16)            # (input, hidden)
    w = jnp.transpose(w_hh).astype(jnp.bfloat16)            # (hidden, hidden)
    b = (b_ih + b_hh).reshape(1, hidden).astype(jnp.float32)
    wd = jnp.zeros((hidden, classes_p), jnp.bfloat16).at[:, :classes].set(
        jnp.transpose(w_dense).astype(jnp.bfloat16))
    bd = jnp.zeros((1, classes_p), jnp.float32).at[:, :classes].set(
        b_dense.reshape(1, classes).astype(jnp.float32))

    kernel = _make_kernel(seq_len, batch_p, hidden, activation)

    out_p = pl.pallas_call(
        kernel,
        out_shape=jax.ShapeDtypeStruct((batch_p, classes_p), jnp.float32),
        grid_spec=pltpu.PrefetchScalarGridSpec(
            num_scalar_prefetch=0,
            grid=(1,),                                       # single invocation
            in_specs=[
                pl.BlockSpec((seq_len * batch_p, input_size), lambda i: (0, 0)),
                pl.BlockSpec((input_size, hidden), lambda i: (0, 0)),
                pl.BlockSpec((hidden, hidden), lambda i: (0, 0)),
                pl.BlockSpec((1, hidden), lambda i: (0, 0)),
                pl.BlockSpec((hidden, classes_p), lambda i: (0, 0)),
                pl.BlockSpec((1, classes_p), lambda i: (0, 0)),
            ],
            out_specs=pl.BlockSpec((batch_p, classes_p), lambda i: (0, 0)),
            scratch_shapes=[
                pltpu.VMEM((seq_len * batch_p, hidden), jnp.float32),  # xp
            ],
        ),
        compiler_params=pltpu.CompilerParams(
            dimension_semantics=("arbitrary",),
        ),
    )(x2d, v, w, b, wd, bd)

    return out_p[:batch, :classes]


def _reference(x, w_ih, w_hh, b_ih, b_hh, w_dense, b_dense, activation="relu"):
    """Pure-JAX mirror of RNN_Classifier.forward, full-f32 matmuls."""
    seq_len, batch, _ = x.shape
    hidden = w_hh.shape[0]
    act = jnp.tanh if activation == "tanh" else (lambda z: jnp.maximum(z, 0.0))
    hp = lax.Precision.HIGHEST
    h = jnp.zeros((batch, hidden), jnp.float32)
    for t in range(seq_len):
        h = act(jnp.dot(x[t], w_ih.T, precision=hp) + b_ih
                + jnp.dot(h, w_hh.T, precision=hp) + b_hh)
    out = jnp.dot(h, w_dense.T, precision=hp) + b_dense   # dense(final hidden)
    return out.reshape(-1, w_dense.shape[0])               # .view(-1, classes)


if __name__ == "__main__":
    # Shapes implied by the module defaults (MNIST row-by-row):
    #   input_size=28, hidden_size=128, classes=10; seq_len=28, small batch=2.
    seq_len, batch, input_size, hidden, classes = 28, 2, 28, 128, 10
    activation = "relu"   # module default

    key = jax.random.PRNGKey(0)
    kx, k1, k2, k3, k4, k5, k6 = jax.random.split(key, 7)

    x = jax.random.normal(kx, (seq_len, batch, input_size), jnp.float32)

    # PyTorch-style uniform init U(-1/sqrt(hidden), 1/sqrt(hidden));
    # recurrent weight scaled down for numerical stability of the relu test.
    bound = 1.0 / math.sqrt(hidden)
    w_ih = jax.random.uniform(k1, (hidden, input_size), jnp.float32, -bound, bound)
    w_hh = 0.5 * jax.random.uniform(k2, (hidden, hidden), jnp.float32, -bound, bound)
    b_ih = jax.random.uniform(k3, (hidden,), jnp.float32, -bound, bound)
    b_hh = jax.random.uniform(k4, (hidden,), jnp.float32, -bound, bound)
    w_dense = jax.random.uniform(k5, (classes, hidden), jnp.float32, -bound, bound)
    b_dense = jax.random.uniform(k6, (classes,), jnp.float32, -bound, bound)

    out = rnn_classifier_forward(x, w_ih, w_hh, b_ih, b_hh,
                                 w_dense, b_dense, activation)
    jax.block_until_ready(out)

    out_ref = _reference(x, w_ih, w_hh, b_ih, b_hh, w_dense, b_dense, activation)

    assert out.shape == (batch, classes), out.shape
    # bf16 MXU operands over a 28-step chained recurrence vs. an f32 reference:
    # observed error is O(1e-3); 2e-2 gives comfortable margin.
    assert jnp.allclose(out, out_ref, atol=2e-2, rtol=2e-2), (
        float(jnp.max(jnp.abs(out - out_ref))))

    print("KERNEL_OK")
</pallas_src>

<mosaic_0001>
module attributes {stable_mosaic.version = 11 : i64} {
  func.func @kernel(%arg0: i32, %arg1: memref<224x28xbf16, #tpu.memory_space<vmem>>, %arg2: memref<28x128xbf16, #tpu.memory_space<vmem>>, %arg3: memref<128x128xbf16, #tpu.memory_space<vmem>>, %arg4: memref<1x128xf32, #tpu.memory_space<vmem>>, %arg5: memref<128x128xbf16, #tpu.memory_space<vmem>>, %arg6: memref<1x128xf32, #tpu.memory_space<vmem>>, %arg7: memref<8x128xf32, #tpu.memory_space<vmem>>, %arg8: memref<224x128xf32, #tpu.memory_space<vmem>>) attributes {dimension_semantics = [#tpu.dimension_semantics<arbitrary>], iteration_bounds = array<i64: 1>, scalar_prefetch = 0 : i64, scratch_operands = 1 : i64, tpu.core_type = #tpu.core_type<tc>, window_params = [{pipeline_mode = #tpu.pipeline_mode<synchronous>, transform_indices = @transform_0, window_bounds = array<i64: 224, 28>}, {pipeline_mode = #tpu.pipeline_mode<synchronous>, transform_indices = @transform_1, window_bounds = array<i64: 28, 128>}, {pipeline_mode = #tpu.pipeline_mode<synchronous>, transform_indices = @transform_2, window_bounds = array<i64: 128, 128>}, {pipeline_mode = #tpu.pipeline_mode<synchronous>, transform_indices = @transform_3, window_bounds = array<i64: 1, 128>}, {pipeline_mode = #tpu.pipeline_mode<synchronous>, transform_indices = @transform_4, window_bounds = array<i64: 128, 128>}, {pipeline_mode = #tpu.pipeline_mode<synchronous>, transform_indices = @transform_5, window_bounds = array<i64: 1, 128>}, {pipeline_mode = #tpu.pipeline_mode<synchronous>, transform_indices = @transform_6, window_bounds = array<i64: 8, 128>}]} {
    %c0 = arith.constant 0 : index
    %c0_0 = arith.constant 0 : index
    %0 = vector.load %arg1[%c0, %c0_0] : memref<224x28xbf16, #tpu.memory_space<vmem>>, vector<224x28xbf16>
    %c0_1 = arith.constant 0 : index
    %c0_2 = arith.constant 0 : index
    %1 = vector.load %arg2[%c0_1, %c0_2] : memref<28x128xbf16, #tpu.memory_space<vmem>>, vector<28x128xbf16>
    %cst = arith.constant dense<0.000000e+00> : vector<224x128xf32>
    %2 = tpu.matmul %0, %1, %cst {dimension_numbers = #tpu.dot_dimension_numbers<[1], [0], [0], [1], [0, 0, 1, 1], [], []>} : vector<224x28xbf16>, vector<28x128xbf16>, vector<224x128xf32> -> vector<224x128xf32>
    %c0_3 = arith.constant 0 : index
    %c0_4 = arith.constant 0 : index
    %3 = vector.load %arg4[%c0_3, %c0_4] : memref<1x128xf32, #tpu.memory_space<vmem>>, vector<1x128xf32>
    %4 = vector.broadcast %3 : vector<1x128xf32> to vector<224x128xf32>
    %5 = arith.addf %2, %4 : vector<224x128xf32>
    %c0_5 = arith.constant 0 : index
    %c0_6 = arith.constant 0 : index
    %6 = vector.load %arg8[%c0_5, %c0_6] : memref<224x128xf32, #tpu.memory_space<vmem>>, vector<224x128xf32>
    tpu.vector_store %arg8[%c0_5, %c0_6], %5 {strides = array<i32>} : memref<224x128xf32, #tpu.memory_space<vmem>>, vector<224x128xf32>,
    %c0_7 = arith.constant 0 : index
    %c0_8 = arith.constant 0 : index
    %7 = vector.load %arg3[%c0_7, %c0_8] : memref<128x128xbf16, #tpu.memory_space<vmem>>, vector<128x128xbf16>
    %c0_9 = arith.constant 0 : index
    %c0_10 = arith.constant 0 : index
    %8 = vector.load %arg5[%c0_9, %c0_10] : memref<128x128xbf16, #tpu.memory_space<vmem>>, vector<128x128xbf16>
    %c0_11 = arith.constant 0 : index
    %c0_12 = arith.constant 0 : index
    %9 = vector.load %arg6[%c0_11, %c0_12] : memref<1x128xf32, #tpu.memory_space<vmem>>, vector<1x128xf32>
    %c0_13 = arith.constant 0 : index
    %c0_14 = arith.constant 0 : index
    %10 = vector.load %arg8[%c0_13, %c0_14] : memref<224x128xf32, #tpu.memory_space<vmem>>, vector<8x128xf32>
    %cst_15 = arith.constant 0.000000e+00 : f32
    %11 = vector.broadcast %cst_15 : f32 to vector<8x128xf32>
    %12 = arith.maximumf %10, %11 : vector<8x128xf32>
    %c1_i32 = arith.constant 1 : i32
    %c8_i32 = arith.constant 8 : i32
    %13 = arith.muli %c1_i32, %c8_i32 : i32
    %14 = tpu.assume_multiple %13, 8 : i32
    %15 = arith.truncf %12 : vector<8x128xf32> to vector<8x128xbf16>
    %cst_16 = arith.constant dense<0.000000e+00> : vector<8x128xf32>
    %16 = tpu.matmul %15, %7, %cst_16 {dimension_numbers = #tpu.dot_dimension_numbers<[1], [0], [0], [1], [0, 0, 1, 1], [], []>} : vector<8x128xbf16>, vector<128x128xbf16>, vector<8x128xf32> -> vector<8x128xf32>
    %17 = arith.index_cast %14 : i32 to index
    %c0_17 = arith.constant 0 : index
    %18 = vector.load %arg8[%17, %c0_17] : memref<224x128xf32, #tpu.memory_space<vmem>>, vector<8x128xf32>
    %19 = arith.addf %16, %18 : vector<8x128xf32>
    %cst_18 = arith.constant 0.000000e+00 : f32
    %20 = vector.broadcast %cst_18 : f32 to vector<8x128xf32>
    %21 = arith.maximumf %19, %20 : vector<8x128xf32>
    %c2_i32 = arith.constant 2 : i32
    %c8_i32_19 = arith.constant 8 : i32
    %22 = arith.muli %c2_i32, %c8_i32_19 : i32
    %23 = tpu.assume_multiple %22, 8 : i32
    %24 = arith.truncf %21 : vector<8x128xf32> to vector<8x128xbf16>
    %cst_20 = arith.constant dense<0.000000e+00> : vector<8x128xf32>
    %25 = tpu.matmul %24, %7, %cst_20 {dimension_numbers = #tpu.dot_dimension_numbers<[1], [0], [0], [1], [0, 0, 1, 1], [], []>} : vector<8x128xbf16>, vector<128x128xbf16>, vector<8x128xf32> -> vector<8x128xf32>
    %26 = arith.index_cast %23 : i32 to index
    %c0_21 = arith.constant 0 : index
    %27 = vector.load %arg8[%26, %c0_21] : memref<224x128xf32, #tpu.memory_space<vmem>>, vector<8x128xf32>
    %28 = arith.addf %25, %27 : vector<8x128xf32>
    %cst_22 = arith.constant 0.000000e+00 : f32
    %29 = vector.broadcast %cst_22 : f32 to vector<8x128xf32>
    %30 = arith.maximumf %28, %29 : vector<8x128xf32>
    %c3_i32 = arith.constant 3 : i32
    %c8_i32_23 = arith.constant 8 : i32
    %31 = arith.muli %c3_i32, %c8_i32_23 : i32
    %32 = tpu.assume_multiple %31, 8 : i32
    %33 = arith.truncf %30 : vector<8x128xf32> to vector<8x128xbf16>
    %cst_24 = arith.constant dense<0.000000e+00> : vector<8x128xf32>
    %34 = tpu.matmul %33, %7, %cst_24 {dimension_numbers = #tpu.dot_dimension_numbers<[1], [0], [0], [1], [0, 0, 1, 1], [], []>} : vector<8x128xbf16>, vector<128x128xbf16>, vector<8x128xf32> -> vector<8x128xf32>
    %35 = arith.index_cast %32 : i32 to index
    %c0_25 = arith.constant 0 : index
    %36 = vector.load %arg8[%35, %c0_25] : memref<224x128xf32, #tpu.memory_space<vmem>>, vector<8x128xf32>
    %37 = arith.addf %34, %36 : vector<8x128xf32>
    %cst_26 = arith.constant 0.000000e+00 : f32
    %38 = vector.broadcast %cst_26 : f32 to vector<8x128xf32>
    %39 = arith.maximumf %37, %38 : vector<8x128xf32>
    %c4_i32 = arith.constant 4 : i32
    %c8_i32_27 = arith.constant 8 : i32
    %40 = arith.muli %c4_i32, %c8_i32_27 : i32
    %41 = tpu.assume_multiple %40, 8 : i32
    %42 = arith.truncf %39 : vector<8x128xf32> to vector<8x128xbf16>
    %cst_28 = arith.constant dense<0.000000e+00> : vector<8x128xf32>
    %43 = tpu.matmul %42, %7, %cst_28 {dimension_numbers = #tpu.dot_dimension_numbers<[1], [0], [0], [1], [0, 0, 1, 1], [], []>} : vector<8x128xbf16>, vector<128x128xbf16>, vector<8x128xf32> -> vector<8x128xf32>
    %44 = arith.index_cast %41 : i32 to index
    %c0_29 = arith.constant 0 : index
    %45 = vector.load %arg8[%44, %c0_29] : memref<224x128xf32, #tpu.memory_space<vmem>>, vector<8x128xf32>
    %46 = arith.addf %43, %45 : vector<8x128xf32>
    %cst_30 = arith.constant 0.000000e+00 : f32
    %47 = vector.broadcast %cst_30 : f32 to vector<8x128xf32>
    %48 = arith.maximumf %46, %47 : vector<8x128xf32>
    %c5_i32 = arith.constant 5 : i32
    %c8_i32_31 = arith.constant 8 : i32
    %49 = arith.muli %c5_i32, %c8_i32_31 : i32
    %50 = tpu.assume_multiple %49, 8 : i32
    %51 = arith.truncf %48 : vector<8x128xf32> to vector<8x128xbf16>
    %cst_32 = arith.constant dense<0.000000e+00> : vector<8x128xf32>
    %52 = tpu.matmul %51, %7, %cst_32 {dimension_numbers = #tpu.dot_dimension_numbers<[1], [0], [0], [1], [0, 0, 1, 1], [], []>} : vector<8x128xbf16>, vector<128x128xbf16>, vector<8x128xf32> -> vector<8x128xf32>
    %53 = arith.index_cast %50 : i32 to index
    %c0_33 = arith.constant 0 : index
    %54 = vector.load %arg8[%53, %c0_33] : memref<224x128xf32, #tpu.memory_space<vmem>>, vector<8x128xf32>
    %55 = arith.addf %52, %54 : vector<8x128xf32>
    %cst_34 = arith.constant 0.000000e+00 : f32
    %56 = vector.broadcast %cst_34 : f32 to vector<8x128xf32>
    %57 = arith.maximumf %55, %56 : vector<8x128xf32>
    %c6_i32 = arith.constant 6 : i32
    %c8_i32_35 = arith.constant 8 : i32
    %58 = arith.muli %c6_i32, %c8_i32_35 : i32
    %59 = tpu.assume_multiple %58, 8 : i32
    %60 = arith.truncf %57 : vector<8x128xf32> to vector<8x128xbf16>
    %cst_36 = arith.constant dense<0.000000e+00> : vector<8x128xf32>
    %61 = tpu.matmul %60, %7, %cst_36 {dimension_numbers = #tpu.dot_dimension_numbers<[1], [0], [0], [1], [0, 0, 1, 1], [], []>} : vector<8x128xbf16>, vector<128x128xbf16>, vector<8x128xf32> -> vector<8x128xf32>
    %62 = arith.index_cast %59 : i32 to index
    %c0_37 = arith.constant 0 : index
    %63 = vector.load %arg8[%62, %c0_37] : memref<224x128xf32, #tpu.memory_space<vmem>>, vector<8x128xf32>
    %64 = arith.addf %61, %63 : vector<8x128xf32>
    %cst_38 = arith.constant 0.000000e+00 : f32
    %65 = vector.broadcast %cst_38 : f32 to vector<8x128xf32>
    %66 = arith.maximumf %64, %65 : vector<8x128xf32>
    %c7_i32 = arith.constant 7 : i32
    %c8_i32_39 = arith.constant 8 : i32
    %67 = arith.muli %c7_i32, %c8_i32_39 : i32
    %68 = tpu.assume_multiple %67, 8 : i32
    %69 = arith.truncf %66 : vector<8x128xf32> to vector<8x128xbf16>
    %cst_40 = arith.constant dense<0.000000e+00> : vector<8x128xf32>
    %70 = tpu.matmul %69, %7, %cst_40 {dimension_numbers = #tpu.dot_dimension_numbers<[1], [0], [0], [1], [0, 0, 1, 1], [], []>} : vector<8x128xbf16>, vector<128x128xbf16>, vector<8x128xf32> -> vector<8x128xf32>
    %71 = arith.index_cast %68 : i32 to index
    %c0_41 = arith.constant 0 : index
    %72 = vector.load %arg8[%71, %c0_41] : memref<224x128xf32, #tpu.memory_space<vmem>>, vector<8x128xf32>
    %73 = arith.addf %70, %72 : vector<8x128xf32>
    %cst_42 = arith.constant 0.000000e+00 : f32
    %74 = vector.broadcast %cst_42 : f32 to vector<8x128xf32>
    %75 = arith.maximumf %73, %74 : vector<8x128xf32>
    %c8_i32_43 = arith.constant 8 : i32
    %c8_i32_44 = arith.constant 8 : i32
    %76 = arith.muli %c8_i32_43, %c8_i32_44 : i32
    %77 = tpu.assume_multiple %76, 8 : i32
    %78 = arith.truncf %75 : vector<8x128xf32> to vector<8x128xbf16>
    %cst_45 = arith.constant dense<0.000000e+00> : vector<8x128xf32>
    %79 = tpu.matmul %78, %7, %cst_45 {dimension_numbers = #tpu.dot_dimension_numbers<[1], [0], [0], [1], [0, 0, 1, 1], [], []>} : vector<8x128xbf16>, vector<128x128xbf16>, vector<8x128xf32> -> vector<8x128xf32>
    %80 = arith.index_cast %77 : i32 to index
    %c0_46 = arith.constant 0 : index
    %81 = vector.load %arg8[%80, %c0_46] : memref<224x128xf32, #tpu.memory_space<vmem>>, vector<8x128xf32>
    %82 = arith.addf %79, %81 : vector<8x128xf32>
    %cst_47 = arith.constant 0.000000e+00 : f32
    %83 = vector.broadcast %cst_47 : f32 to vector<8x128xf32>
    %84 = arith.maximumf %82, %83 : vector<8x128xf32>
    %c9_i32 = arith.constant 9 : i32
    %c8_i32_48 = arith.constant 8 : i32
    %85 = arith.muli %c9_i32, %c8_i32_48 : i32
    %86 = tpu.assume_multiple %85, 8 : i32
    %87 = arith.truncf %84 : vector<8x128xf32> to vector<8x128xbf16>
    %cst_49 = arith.constant dense<0.000000e+00> : vector<8x128xf32>
    %88 = tpu.matmul %87, %7, %cst_49 {dimension_numbers = #tpu.dot_dimension_numbers<[1], [0], [0], [1], [0, 0, 1, 1], [], []>} : vector<8x128xbf16>, vector<128x128xbf16>, vector<8x128xf32> -> vector<8x128xf32>
    %89 = arith.index_cast %86 : i32 to index
    %c0_50 = arith.constant 0 : index
    %90 = vector.load %arg8[%89, %c0_50] : memref<224x128xf32, #tpu.memory_space<vmem>>, vector<8x128xf32>
    %91 = arith.addf %88, %90 : vector<8x128xf32>
    %cst_51 = arith.constant 0.000000e+00 : f32
    %92 = vector.broadcast %cst_51 : f32 to vector<8x128xf32>
    %93 = arith.maximumf %91, %92 : vector<8x128xf32>
    %c10_i32 = arith.constant 10 : i32
    %c8_i32_52 = arith.constant 8 : i32
    %94 = arith.muli %c10_i32, %c8_i32_52 : i32
    %95 = tpu.assume_multiple %94, 8 : i32
    %96 = arith.truncf %93 : vector<8x128xf32> to vector<8x128xbf16>
    %cst_53 = arith.constant dense<0.000000e+00> : vector<8x128xf32>
    %97 = tpu.matmul %96, %7, %cst_53 {dimension_numbers = #tpu.dot_dimension_numbers<[1], [0], [0], [1], [0, 0, 1, 1], [], []>} : vector<8x128xbf16>, vector<128x128xbf16>, vector<8x128xf32> -> vector<8x128xf32>
    %98 = arith.index_cast %95 : i32 to index
    %c0_54 = arith.constant 0 : index
    %99 = vector.load %arg8[%98, %c0_54] : memref<224x128xf32, #tpu.memory_space<vmem>>, vector<8x128xf32>
    %100 = arith.addf %97, %99 : vector<8x128xf32>
    %cst_55 = arith.constant 0.000000e+00 : f32
    %101 = vector.broadcast %cst_55 : f32 to vector<8x128xf32>
    %102 = arith.maximumf %100, %101 : vector<8x128xf32>
    %c11_i32 = arith.constant 11 : i32
    %c8_i32_56 = arith.constant 8 : i32
    %103 = arith.muli %c11_i32, %c8_i32_56 : i32
    %104 = tpu.assume_multiple %103, 8 : i32
    %105 = arith.truncf %102 : vector<8x128xf32> to vector<8x128xbf16>
    %cst_57 = arith.constant dense<0.000000e+00> : vector<8x128xf32>
    %106 = tpu.matmul %105, %7, %cst_57 {dimension_numbers = #tpu.dot_dimension_numbers<[1], [0], [0], [1], [0, 0, 1, 1], [], []>} : vector<8x128xbf16>, vector<128x128xbf16>, vector<8x128xf32> -> vector<8x128xf32>
    %107 = arith.index_cast %104 : i32 to index
    %c0_58 = arith.constant 0 : index
    %108 = vector.load %arg8[%107, %c0_58] : memref<224x128xf32, #tpu.memory_space<vmem>>, vector<8x128xf32>
    %109 = arith.addf %106, %108 : vector<8x128xf32>
    %cst_59 = arith.constant 0.000000e+00 : f32
    %110 = vector.broadcast %cst_59 : f32 to vector<8x128xf32>
    %111 = arith.maximumf %109, %110 : vector<8x128xf32>
    %c12_i32 = arith.constant 12 : i32
    %c8_i32_60 = arith.constant 8 : i32
    %112 = arith.muli %c12_i32, %c8_i32_60 : i32
    %113 = tpu.assume_multiple %112, 8 : i32
    %114 = arith.truncf %111 : vector<8x128xf32> to vector<8x128xbf16>
    %cst_61 = arith.constant dense<0.000000e+00> : vector<8x128xf32>
    %115 = tpu.matmul %114, %7, %cst_61 {dimension_numbers = #tpu.dot_dimension_numbers<[1], [0], [0], [1], [0, 0, 1, 1], [], []>} : vector<8x128xbf16>, vector<128x128xbf16>, vector<8x128xf32> -> vector<8x128xf32>
    %116 = arith.index_cast %113 : i32 to index
    %c0_62 = arith.constant 0 : index
    %117 = vector.load %arg8[%116, %c0_62] : memref<224x128xf32, #tpu.memory_space<vmem>>, vector<8x128xf32>
    %118 = arith.addf %115, %117 : vector<8x128xf32>
    %cst_63 = arith.constant 0.000000e+00 : f32
    %119 = vector.broadcast %cst_63 : f32 to vector<8x128xf32>
    %120 = arith.maximumf %118, %119 : vector<8x128xf32>
    %c13_i32 = arith.constant 13 : i32
    %c8_i32_64 = arith.constant 8 : i32
    %121 = arith.muli %c13_i32, %c8_i32_64 : i32
    %122 = tpu.assume_multiple %121, 8 : i32
    %123 = arith.truncf %120 : vector<8x128xf32> to vector<8x128xbf16>
    %cst_65 = arith.constant dense<0.000000e+00> : vector<8x128xf32>
    %124 = tpu.matmul %123, %7, %cst_65 {dimension_numbers = #tpu.dot_dimension_numbers<[1], [0], [0], [1], [0, 0, 1, 1], [], []>} : vector<8x128xbf16>, vector<128x128xbf16>, vector<8x128xf32> -> vector<8x128xf32>
    %125 = arith.index_cast %122 : i32 to index
    %c0_66 = arith.constant 0 : index
    %126 = vector.load %arg8[%125, %c0_66] : memref<224x128xf32, #tpu.memory_space<vmem>>, vector<8x128xf32>
    %127 = arith.addf %124, %126 : vector<8x128xf32>
    %cst_67 = arith.constant 0.000000e+00 : f32
    %128 = vector.broadcast %cst_67 : f32 to vector<8x128xf32>
    %129 = arith.maximumf %127, %128 : vector<8x128xf32>
    %c14_i32 = arith.constant 14 : i32
    %c8_i32_68 = arith.constant 8 : i32
    %130 = arith.muli %c14_i32, %c8_i32_68 : i32
    %131 = tpu.assume_multiple %130, 8 : i32
    %132 = arith.truncf %129 : vector<8x128xf32> to vector<8x128xbf16>
    %cst_69 = arith.constant dense<0.000000e+00> : vector<8x128xf32>
    %133 = tpu.matmul %132, %7, %cst_69 {dimension_numbers = #tpu.dot_dimension_numbers<[1], [0], [0], [1], [0, 0, 1, 1], [], []>} : vector<8x128xbf16>, vector<128x128xbf16>, vector<8x128xf32> -> vector<8x128xf32>
    %134 = arith.index_cast %131 : i32 to index
    %c0_70 = arith.constant 0 : index
    %135 = vector.load %arg8[%134, %c0_70] : memref<224x128xf32, #tpu.memory_space<vmem>>, vector<8x128xf32>
    %136 = arith.addf %133, %135 : vector<8x128xf32>
    %cst_71 = arith.constant 0.000000e+00 : f32
    %137 = vector.broadcast %cst_71 : f32 to vector<8x128xf32>
    %138 = arith.maximumf %136, %137 : vector<8x128xf32>
    %c15_i32 = arith.constant 15 : i32
    %c8_i32_72 = arith.constant 8 : i32
    %139 = arith.muli %c15_i32, %c8_i32_72 : i32
    %140 = tpu.assume_multiple %139, 8 : i32
    %141 = arith.truncf %138 : vector<8x128xf32> to vector<8x128xbf16>
    %cst_73 = arith.constant dense<0.000000e+00> : vector<8x128xf32>
    %142 = tpu.matmul %141, %7, %cst_73 {dimension_numbers = #tpu.dot_dimension_numbers<[1], [0], [0], [1], [0, 0, 1, 1], [], []>} : vector<8x128xbf16>, vector<128x128xbf16>, vector<8x128xf32> -> vector<8x128xf32>
    %143 = arith.index_cast %140 : i32 to index
    %c0_74 = arith.constant 0 : index
    %144 = vector.load %arg8[%143, %c0_74] : memref<224x128xf32, #tpu.memory_space<vmem>>, vector<8x128xf32>
    %145 = arith.addf %142, %144 : vector<8x128xf32>
    %cst_75 = arith.constant 0.000000e+00 : f32
    %146 = vector.broadcast %cst_75 : f32 to vector<8x128xf32>
    %147 = arith.maximumf %145, %146 : vector<8x128xf32>
    %c16_i32 = arith.constant 16 : i32
    %c8_i32_76 = arith.constant 8 : i32
    %148 = arith.muli %c16_i32, %c8_i32_76 : i32
    %149 = tpu.assume_multiple %148, 8 : i32
    %150 = arith.truncf %147 : vector<8x128xf32> to vector<8x128xbf16>
    %cst_77 = arith.constant dense<0.000000e+00> : vector<8x128xf32>
    %151 = tpu.matmul %150, %7, %cst_77 {dimension_numbers = #tpu.dot_dimension_numbers<[1], [0], [0], [1], [0, 0, 1, 1], [], []>} : vector<8x128xbf16>, vector<128x128xbf16>, vector<8x128xf32> -> vector<8x128xf32>
    %152 = arith.index_cast %149 : i32 to index
    %c0_78 = arith.constant 0 : index
    %153 = vector.load %arg8[%152, %c0_78] : memref<224x128xf32, #tpu.memory_space<vmem>>, vector<8x128xf32>
    %154 = arith.addf %151, %153 : vector<8x128xf32>
    %cst_79 = arith.constant 0.000000e+00 : f32
    %155 = vector.broadcast %cst_79 : f32 to vector<8x128xf32>
    %156 = arith.maximumf %154, %155 : vector<8x128xf32>
    %c17_i32 = arith.constant 17 : i32
    %c8_i32_80 = arith.constant 8 : i32
    %157 = arith.muli %c17_i32, %c8_i32_80 : i32
    %158 = tpu.assume_multiple %157, 8 : i32
    %159 = arith.truncf %156 : vector<8x128xf32> to vector<8x128xbf16>
    %cst_81 = arith.constant dense<0.000000e+00> : vector<8x128xf32>
    %160 = tpu.matmul %159, %7, %cst_81 {dimension_numbers = #tpu.dot_dimension_numbers<[1], [0], [0], [1], [0, 0, 1, 1], [], []>} : vector<8x128xbf16>, vector<128x128xbf16>, vector<8x128xf32> -> vector<8x128xf32>
    %161 = arith.index_cast %158 : i32 to index
    %c0_82 = arith.constant 0 : index
    %162 = vector.load %arg8[%161, %c0_82] : memref<224x128xf32, #tpu.memory_space<vmem>>, vector<8x128xf32>
    %163 = arith.addf %160, %162 : vector<8x128xf32>
    %cst_83 = arith.constant 0.000000e+00 : f32
    %164 = vector.broadcast %cst_83 : f32 to vector<8x128xf32>
    %165 = arith.maximumf %163, %164 : vector<8x128xf32>
    %c18_i32 = arith.constant 18 : i32
    %c8_i32_84 = arith.constant 8 : i32
    %166 = arith.muli %c18_i32, %c8_i32_84 : i32
    %167 = tpu.assume_multiple %166, 8 : i32
    %168 = arith.truncf %165 : vector<8x128xf32> to vector<8x128xbf16>
    %cst_85 = arith.constant dense<0.000000e+00> : vector<8x128xf32>
    %169 = tpu.matmul %168, %7, %cst_85 {dimension_numbers = #tpu.dot_dimension_numbers<[1], [0], [0], [1], [0, 0, 1, 1], [], []>} : vector<8x128xbf16>, vector<128x128xbf16>, vector<8x128xf32> -> vector<8x128xf32>
    %170 = arith.index_cast %167 : i32 to index
    %c0_86 = arith.constant 0 : index
    %171 = vector.load %arg8[%170, %c0_86] : memref<224x128xf32, #tpu.memory_space<vmem>>, vector<8x128xf32>
    %172 = arith.addf %169, %171 : vector<8x128xf32>
    %cst_87 = arith.constant 0.000000e+00 : f32
    %173 = vector.broadcast %cst_87 : f32 to vector<8x128xf32>
    %174 = arith.maximumf %172, %173 : vector<8x128xf32>
    %c19_i32 = arith.constant 19 : i32
    %c8_i32_88 = arith.constant 8 : i32
    %175 = arith.muli %c19_i32, %c8_i32_88 : i32
    %176 = tpu.assume_multiple %175, 8 : i32
    %177 = arith.truncf %174 : vector<8x128xf32> to vector<8x128xbf16>
    %cst_89 = arith.constant dense<0.000000e+00> : vector<8x128xf32>
    %178 = tpu.matmul %177, %7, %cst_89 {dimension_numbers = #tpu.dot_dimension_numbers<[1], [0], [0], [1], [0, 0, 1, 1], [], []>} : vector<8x128xbf16>, vector<128x128xbf16>, vector<8x128xf32> -> vector<8x128xf32>
    %179 = arith.index_cast %176 : i32 to index
    %c0_90 = arith.constant 0 : index
    %180 = vector.load %arg8[%179, %c0_90] : memref<224x128xf32, #tpu.memory_space<vmem>>, vector<8x128xf32>
    %181 = arith.addf %178, %180 : vector<8x128xf32>
    %cst_91 = arith.constant 0.000000e+00 : f32
    %182 = vector.broadcast %cst_91 : f32 to vector<8x128xf32>
    %183 = arith.maximumf %181, %182 : vector<8x128xf32>
    %c20_i32 = arith.constant 20 : i32
    %c8_i32_92 = arith.constant 8 : i32
    %184 = arith.muli %c20_i32, %c8_i32_92 : i32
    %185 = tpu.assume_multiple %184, 8 : i32
    %186 = arith.truncf %183 : vector<8x128xf32> to vector<8x128xbf16>
    %cst_93 = arith.constant dense<0.000000e+00> : vector<8x128xf32>
    %187 = tpu.matmul %186, %7, %cst_93 {dimension_numbers = #tpu.dot_dimension_numbers<[1], [0], [0], [1], [0, 0, 1, 1], [], []>} : vector<8x128xbf16>, vector<128x128xbf16>, vector<8x128xf32> -> vector<8x128xf32>
    %188 = arith.index_cast %185 : i32 to index
    %c0_94 = arith.constant 0 : index
    %189 = vector.load %arg8[%188, %c0_94] : memref<224x128xf32, #tpu.memory_space<vmem>>, vector<8x128xf32>
    %190 = arith.addf %187, %189 : vector<8x128xf32>
    %cst_95 = arith.constant 0.000000e+00 : f32
    %191 = vector.broadcast %cst_95 : f32 to vector<8x128xf32>
    %192 = arith.maximumf %190, %191 : vector<8x128xf32>
    %c21_i32 = arith.constant 21 : i32
    %c8_i32_96 = arith.constant 8 : i32
    %193 = arith.muli %c21_i32, %c8_i32_96 : i32
    %194 = tpu.assume_multiple %193, 8 : i32
    %195 = arith.truncf %192 : vector<8x128xf32> to vector<8x128xbf16>
    %cst_97 = arith.constant dense<0.000000e+00> : vector<8x128xf32>
    %196 = tpu.matmul %195, %7, %cst_97 {dimension_numbers = #tpu.dot_dimension_numbers<[1], [0], [0], [1], [0, 0, 1, 1], [], []>} : vector<8x128xbf16>, vector<128x128xbf16>, vector<8x128xf32> -> vector<8x128xf32>
    %197 = arith.index_cast %194 : i32 to index
    %c0_98 = arith.constant 0 : index
    %198 = vector.load %arg8[%197, %c0_98] : memref<224x128xf32, #tpu.memory_space<vmem>>, vector<8x128xf32>
    %199 = arith.addf %196, %198 : vector<8x128xf32>
    %cst_99 = arith.constant 0.000000e+00 : f32
    %200 = vector.broadcast %cst_99 : f32 to vector<8x128xf32>
    %201 = arith.maximumf %199, %200 : vector<8x128xf32>
    %c22_i32 = arith.constant 22 : i32
    %c8_i32_100 = arith.constant 8 : i32
    %202 = arith.muli %c22_i32, %c8_i32_100 : i32
    %203 = tpu.assume_multiple %202, 8 : i32
    %204 = arith.truncf %201 : vector<8x128xf32> to vector<8x128xbf16>
    %cst_101 = arith.constant dense<0.000000e+00> : vector<8x128xf32>
    %205 = tpu.matmul %204, %7, %cst_101 {dimension_numbers = #tpu.dot_dimension_numbers<[1], [0], [0], [1], [0, 0, 1, 1], [], []>} : vector<8x128xbf16>, vector<128x128xbf16>, vector<8x128xf32> -> vector<8x128xf32>
    %206 = arith.index_cast %203 : i32 to index
    %c0_102 = arith.constant 0 : index
    %207 = vector.load %arg8[%206, %c0_102] : memref<224x128xf32, #tpu.memory_space<vmem>>, vector<8x128xf32>
    %208 = arith.addf %205, %207 : vector<8x128xf32>
    %cst_103 = arith.constant 0.000000e+00 : f32
    %209 = vector.broadcast %cst_103 : f32 to vector<8x128xf32>
    %210 = arith.maximumf %208, %209 : vector<8x128xf32>
    %c23_i32 = arith.constant 23 : i32
    %c8_i32_104 = arith.constant 8 : i32
    %211 = arith.muli %c23_i32, %c8_i32_104 : i32
    %212 = tpu.assume_multiple %211, 8 : i32
    %213 = arith.truncf %210 : vector<8x128xf32> to vector<8x128xbf16>
    %cst_105 = arith.constant dense<0.000000e+00> : vector<8x128xf32>
    %214 = tpu.matmul %213, %7, %cst_105 {dimension_numbers = #tpu.dot_dimension_numbers<[1], [0], [0], [1], [0, 0, 1, 1], [], []>} : vector<8x128xbf16>, vector<128x128xbf16>, vector<8x128xf32> -> vector<8x128xf32>
    %215 = arith.index_cast %212 : i32 to index
    %c0_106 = arith.constant 0 : index
    %216 = vector.load %arg8[%215, %c0_106] : memref<224x128xf32, #tpu.memory_space<vmem>>, vector<8x128xf32>
    %217 = arith.addf %214, %216 : vector<8x128xf32>
    %cst_107 = arith.constant 0.000000e+00 : f32
    %218 = vector.broadcast %cst_107 : f32 to vector<8x128xf32>
    %219 = arith.maximumf %217, %218 : vector<8x128xf32>
    %c24_i32 = arith.constant 24 : i32
    %c8_i32_108 = arith.constant 8 : i32
    %220 = arith.muli %c24_i32, %c8_i32_108 : i32
    %221 = tpu.assume_multiple %220, 8 : i32
    %222 = arith.truncf %219 : vector<8x128xf32> to vector<8x128xbf16>
    %cst_109 = arith.constant dense<0.000000e+00> : vector<8x128xf32>
    %223 = tpu.matmul %222, %7, %cst_109 {dimension_numbers = #tpu.dot_dimension_numbers<[1], [0], [0], [1], [0, 0, 1, 1], [], []>} : vector<8x128xbf16>, vector<128x128xbf16>, vector<8x128xf32> -> vector<8x128xf32>
    %224 = arith.index_cast %221 : i32 to index
    %c0_110 = arith.constant 0 : index
    %225 = vector.load %arg8[%224, %c0_110] : memref<224x128xf32, #tpu.memory_space<vmem>>, vector<8x128xf32>
    %226 = arith.addf %223, %225 : vector<8x128xf32>
    %cst_111 = arith.constant 0.000000e+00 : f32
    %227 = vector.broadcast %cst_111 : f32 to vector<8x128xf32>
    %228 = arith.maximumf %226, %227 : vector<8x128xf32>
    %c25_i32 = arith.constant 25 : i32
    %c8_i32_112 = arith.constant 8 : i32
    %229 = arith.muli %c25_i32, %c8_i32_112 : i32
    %230 = tpu.assume_multiple %229, 8 : i32
    %231 = arith.truncf %228 : vector<8x128xf32> to vector<8x128xbf16>
    %cst_113 = arith.constant dense<0.000000e+00> : vector<8x128xf32>
    %232 = tpu.matmul %231, %7, %cst_113 {dimension_numbers = #tpu.dot_dimension_numbers<[1], [0], [0], [1], [0, 0, 1, 1], [], []>} : vector<8x128xbf16>, vector<128x128xbf16>, vector<8x128xf32> -> vector<8x128xf32>
    %233 = arith.index_cast %230 : i32 to index
    %c0_114 = arith.constant 0 : index
    %234 = vector.load %arg8[%233, %c0_114] : memref<224x128xf32, #tpu.memory_space<vmem>>, vector<8x128xf32>
    %235 = arith.addf %232, %234 : vector<8x128xf32>
    %cst_115 = arith.constant 0.000000e+00 : f32
    %236 = vector.broadcast %cst_115 : f32 to vector<8x128xf32>
    %237 = arith.maximumf %235, %236 : vector<8x128xf32>
    %c26_i32 = arith.constant 26 : i32
    %c8_i32_116 = arith.constant 8 : i32
    %238 = arith.muli %c26_i32, %c8_i32_116 : i32
    %239 = tpu.assume_multiple %238, 8 : i32
    %240 = arith.truncf %237 : vector<8x128xf32> to vector<8x128xbf16>
    %cst_117 = arith.constant dense<0.000000e+00> : vector<8x128xf32>
    %241 = tpu.matmul %240, %7, %cst_117 {dimension_numbers = #tpu.dot_dimension_numbers<[1], [0], [0], [1], [0, 0, 1, 1], [], []>} : vector<8x128xbf16>, vector<128x128xbf16>, vector<8x128xf32> -> vector<8x128xf32>
    %242 = arith.index_cast %239 : i32 to index
    %c0_118 = arith.constant 0 : index
    %243 = vector.load %arg8[%242, %c0_118] : memref<224x128xf32, #tpu.memory_space<vmem>>, vector<8x128xf32>
    %244 = arith.addf %241, %243 : vector<8x128xf32>
    %cst_119 = arith.constant 0.000000e+00 : f32
    %245 = vector.broadcast %cst_119 : f32 to vector<8x128xf32>
    %246 = arith.maximumf %244, %245 : vector<8x128xf32>
    %c27_i32 = arith.constant 27 : i32
    %c8_i32_120 = arith.constant 8 : i32
    %247 = arith.muli %c27_i32, %c8_i32_120 : i32
    %248 = tpu.assume_multiple %247, 8 : i32
    %249 = arith.truncf %246 : vector<8x128xf32> to vector<8x128xbf16>
    %cst_121 = arith.constant dense<0.000000e+00> : vector<8x128xf32>
    %250 = tpu.matmul %249, %7, %cst_121 {dimension_numbers = #tpu.dot_dimension_numbers<[1], [0], [0], [1], [0, 0, 1, 1], [], []>} : vector<8x128xbf16>, vector<128x128xbf16>, vector<8x128xf32> -> vector<8x128xf32>
    %251 = arith.index_cast %248 : i32 to index
    %c0_122 = arith.constant 0 : index
    %252 = vector.load %arg8[%251, %c0_122] : memref<224x128xf32, #tpu.memory_space<vmem>>, vector<8x128xf32>
    %253 = arith.addf %250, %252 : vector<8x128xf32>
    %cst_123 = arith.constant 0.000000e+00 : f32
    %254 = vector.broadcast %cst_123 : f32 to vector<8x128xf32>
    %255 = arith.maximumf %253, %254 : vector<8x128xf32>
    %c27_i32_124 = arith.constant 27 : i32
    %256 = arith.truncf %255 : vector<8x128xf32> to vector<8x128xbf16>
    %cst_125 = arith.constant dense<0.000000e+00> : vector<8x128xf32>
    %257 = tpu.matmul %256, %8, %cst_125 {dimension_numbers = #tpu.dot_dimension_numbers<[1], [0], [0], [1], [0, 0, 1, 1], [], []>} : vector<8x128xbf16>, vector<128x128xbf16>, vector<8x128xf32> -> vector<8x128xf32>
    %258 = vector.broadcast %9 : vector<1x128xf32> to vector<8x128xf32>
    %259 = arith.addf %257, %258 : vector<8x128xf32>
    %c0_126 = arith.constant 0 : index
    %c0_127 = arith.constant 0 : index
    %260 = vector.load %arg7[%c0_126, %c0_127] : memref<8x128xf32, #tpu.memory_space<vmem>>, vector<8x128xf32>
    tpu.vector_store %arg7[%c0_126, %c0_127], %259 {strides = array<i32>} : memref<8x128xf32, #tpu.memory_space<vmem>>, vector<8x128xf32>,
    return
  }
  func.func @transform_0(%arg0: i32) -> (i32, i32) {
    %c0_i32 = arith.constant 0 : i32
    %c0_i32_0 = arith.constant 0 : i32
    %c0_i32_1 = arith.constant 0 : i32
    return %c0_i32, %c0_i32_0 : i32, i32
  }
  func.func @transform_1(%arg0: i32) -> (i32, i32) {
    %c0_i32 = arith.constant 0 : i32
    %c0_i32_0 = arith.constant 0 : i32
    %c0_i32_1 = arith.constant 0 : i32
    return %c0_i32, %c0_i32_0 : i32, i32
  }
  func.func @transform_2(%arg0: i32) -> (i32, i32) {
    %c0_i32 = arith.constant 0 : i32
    %c0_i32_0 = arith.constant 0 : i32
    %c0_i32_1 = arith.constant 0 : i32
    return %c0_i32, %c0_i32_0 : i32, i32
  }
  func.func @transform_3(%arg0: i32) -> (i32, i32) {
    %c0_i32 = arith.constant 0 : i32
    %c0_i32_0 = arith.constant 0 : i32
    %c0_i32_1 = arith.constant 0 : i32
    return %c0_i32, %c0_i32_0 : i32, i32
  }
  func.func @transform_4(%arg0: i32) -> (i32, i32) {
    %c0_i32 = arith.constant 0 : i32
    %c0_i32_0 = arith.constant 0 : i32
    %c0_i32_1 = arith.constant 0 : i32
    return %c0_i32, %c0_i32_0 : i32, i32
  }
  func.func @transform_5(%arg0: i32) -> (i32, i32) {
    %c0_i32 = arith.constant 0 : i32
    %c0_i32_0 = arith.constant 0 : i32
    %c0_i32_1 = arith.constant 0 : i32
    return %c0_i32, %c0_i32_0 : i32, i32
  }
  func.func @transform_6(%arg0: i32) -> (i32, i32) {
    %c0_i32 = arith.constant 0 : i32
    %c0_i32_0 = arith.constant 0 : i32
    %c0_i32_1 = arith.constant 0 : i32
    return %c0_i32, %c0_i32_0 : i32, i32
  }
}

</mosaic_0001>

<bundles_post_ra>
// kernel: tpu_custom_call.1
= control target key start
LH: loop header
LB: loop body
LE: loop exit
PB: predicated region body
PF: predicated region fallthrough
CT: control target
= control target key end

     0   :  { %vm188_vm0 = vcmask 1045504   ;;  %vm145_vm1 = vcmask 228352   ;;  %v2728_v8 = vmov 0.0   ;;  %s3559_s0 = inlined_call_operand.vmem [shape: bf16[224,28], index: 0, kind: input, shape index: {}]   ;;  %s3560_s1 = inlined_call_operand.vmem [shape: bf16[28,128], index: 1, kind: input, shape index: {}]   ;;  %s3561_s2 = inlined_call_operand.vmem [shape: bf16[128,128], index: 2, kind: input, shape index: {}]   ;;  %s3562_s3 = inlined_call_operand.vmem [shape: f32[1,128], index: 3, kind: input, shape index: {}]   ;;  %s3563_s4 = inlined_call_operand.vmem [shape: bf16[128,128], index: 4, kind: input, shape index: {}]   ;;  %s3564_s5 = inlined_call_operand.vmem [shape: f32[1,128], index: 5, kind: input, shape index: {}]   ;;  %s3565_s6 = inlined_call_operand.hbm [shape: f32[8,128], index: 6, kind: output, shape index: {}]  }
   0x1   :  { %v2663_v0 = vld [vmem:[%s3560_s1] sm:$0xff]   ;;  %v2664_v1 = vld [vmem:[%s3560_s1 + $0x8] sm:$0x3f]   ;;  %v2672_v9 = vld [vmem:[%s3559_s0 + $0x50] sm:$0xff]  }
   0x2   :  { %2062 = vmatprep.subr.bf16.mxu0 %v2663_v0  ;;  %v2665_v2 = vld [vmem:[%s3559_s0] sm:$0xff]   ;;  %2654 = vmatprep.subr.bf16.mxu1 %v2663_v0  ;;  %v190_v3 = vsel %vm188_vm0, %v2664_v1, 0  ;;  %v2666_v5 = vld [vmem:[%s3559_s0 + $0x8] sm:$0xff]   ;;  %v2810_v11 = vld [vmem:[%s3561_s2 + $0x10] sm:$0xff]  }
   0x3   :  { %2063 = vmatpush3.bf16.msra.mxu0 %v2663_v0  ;;  %2656 = vmatpush3.bf16.msra.mxu1 %v2663_v0  ;;  %v2667_v4 = vld [vmem:[%s3559_s0 + $0x40] sm:$0xff]   ;;  %v2668_v6 = vld [vmem:[%s3559_s0 + $0x48] sm:$0xff]   ;;  %v2673_v12 = vld [vmem:[%s3559_s0 + $0x58] sm:$0xff]  }
   0x4   :  { %2658 = vmatprep.subr.msk.bf16.mxu0 %vm188_vm0, %v2664_v1  ;;  %2066 = vmatprep.mubr.msk.bf16.mxu0 %vm145_vm1, %v2665_v2  ;;  %v2789_v7 = vld [vmem:[%s3561_s2] sm:$0xff]   ;;  %v2802_v10 = vld [vmem:[%s3561_s2 + $0x8] sm:$0xff]   ;;  %v2825_v14 = vld [vmem:[%s3561_s2 + $0x18] sm:$0xff]  }
   0x5   :  { %2659 = vmatprep.subr.msk.bf16.mxu1 %vm188_vm0, %v2664_v1  ;;  %2082 = vmatprep.mubr.msk.bf16.mxu1 %vm145_vm1, %v2667_v4  ;;  %v2676_v13 = vld [vmem:[%s3559_s0 + $0x60] sm:$0xff]   ;;  %v2677_v15 = vld [vmem:[%s3559_s0 + $0x68] sm:$0xff]  }
   0x6   :  { %v2839_v16 = vld [vmem:[%s3561_s2 + $0x20] sm:$0xff]  }
   0x7   :  { %2065 = vmatpush3.bf16.msra.mxu0 %v190_v3  ;;  %2657 = vmatpush3.bf16.msra.mxu1 %v190_v3 }
   0x8   :  { %2094 = vmatprep.subr.bf16.mxu1 %v2728_v8  ;;  %2114 = vmatprep.subr.bf16.mxu0 %v2728_v8 }
   0xa   :  { %2067 = vmatmul.mubr.msk.bf16.vlgmr.msra.gmra.mrb[0].mxu0 %vm145_vm1, %v2666_v5  ;;  %2083 = vmatmul.mubr.msk.bf16.vlgmr.msra.gmra.mrb[0].mxu1 %vm145_vm1, %v2668_v6 }
   0xb   :  { %2095 = vmatpush3.bf16.msra.mxu1 %v2789_v7  ;;  %2086 = vmatprep.mubr.msk.bf16.mxu1 %vm145_vm1, %v2672_v9 }
   0xc   :  { %2096 = vmatprep.subr.bf16.mxu1 %v2728_v8  ;;  %2115 = vmatpush3.bf16.msra.mxu0 %v2789_v7 }
   0xd   :  { %2116 = vmatprep.subr.bf16.mxu0 %v2728_v8 }
   0xf   :  { %2097 = vmatpush3.bf16.msra.mxu1 %v2802_v10 }
  0x10   :  { %2098 = vmatprep.subr.bf16.mxu1 %v2728_v8  ;;  %2117 = vmatpush3.bf16.msra.mxu0 %v2802_v10 }
  0x11   :  { %2118 = vmatprep.subr.bf16.mxu0 %v2728_v8 }
  0x12   :  { %2087 = vmatmul.mubr.msk.bf16.gmra.mrb[4].mxu1 %vm145_vm1, %v2673_v12 }
  0x13   :  { %2099 = vmatpush3.bf16.msra.mxu1 %v2810_v11  ;;  %2090 = vmatprep.mubr.msk.bf16.mxu1 %vm145_vm1, %v2676_v13 }
  0x14   :  { %2100 = vmatprep.subr.bf16.mxu1 %v2728_v8  ;;  %2119 = vmatpush3.bf16.msra.mxu0 %v2810_v11 }
  0x15   :  { %2120 = vmatprep.subr.bf16.mxu0 %v2728_v8 }
  0x17   :  { %2101 = vmatpush3.bf16.msra.mxu1 %v2825_v14 }
  0x18   :  { %2102 = vmatprep.subr.bf16.mxu1 %v2728_v8  ;;  %2121 = vmatpush3.bf16.msra.mxu0 %v2825_v14 }
  0x19   :  { %2122 = vmatprep.subr.bf16.mxu0 %v2728_v8 }
  0x1a   :  { %2091 = vmatmul.mubr.msk.bf16.gmra.mrb[8].mxu1 %vm145_vm1, %v2677_v15 }
  0x1b   :  { %11 = vsyncpa [#allocation4], 0  ;;  %2103 = vmatpush3.bf16.msra.mxu1 %v2839_v16  ;;  %v2851_v17 = vld [vmem:[%s3561_s2 + $0x28] sm:$0xff]   ;;  %v2863_v18 = vld [vmem:[%s3561_s2 + $0x30] sm:$0xff]   ;;  %vm2729_vm2 = vmmov 0   ;;  %s2730_s28 = smov [#allocation3]  }
  0x1c   :  { %2104 = vmatprep.subr.bf16.mxu1 %v2728_v8  ;;  %2123 = vmatpush3.bf16.msra.mxu0 %v2839_v16  ;;  %v2872_v19 = vld [vmem:[%s3561_s2 + $0x38] sm:$0xff]   ;;  %v2681_v20 = vld [vmem:[%s3559_s0 + $0x10] sm:$0xff]   ;;  %v2683_v22 = vld [vmem:[%s3559_s0 + $0x20] sm:$0xff]   ;;  %s1738_s29 = sshll.u32 %s2730_s28, 4  ;;  %s1739_s29 = int_to_ptr.vmem [resolvable:$true] %s1738_s29 }
  0x1d   :  { %2124 = vmatprep.subr.bf16.mxu0 %v2728_v8  ;;  %2110 = vmatprep.mubr.msk.bf16.mxu1 %vm2729_vm2, %v2728_v8  ;;  %v2682_v21 = vld [vmem:[%s3559_s0 + $0x18] sm:$0xff]   ;;  %v2684_v23 = vld [vmem:[%s3559_s0 + $0x28] sm:$0xff]   ;;  %v2685_v24 = vld [vmem:[%s3559_s0 + $0x30] sm:$0xff]   ;;  %p2709_p1 = scmp.lt.s32.totalorder %s1739_s29, %s1739_s29 }
  0x1e   :  { %2070 = vmatprep.mubr.msk.bf16.mxu0 %vm145_vm1, %v2681_v20  ;;  %v2686_v25 = vld [vmem:[%s3559_s0 + $0x38] sm:$0xff]   ;;  %v2909_v26 = vld [vmem:[%s3562_s3] ss:$0 sm:$0xff] }
  0x1f   :  { %2105 = vmatpush3.bf16.msra.mxu1 %v2851_v17  ;;  %2071 = vmatmul.mubr.msk.bf16.gmra.mrb[4].mxu0 %vm145_vm1, %v2682_v21 }
  0x20   :  { %2106 = vmatprep.subr.bf16.mxu1 %v2728_v8  ;;  %2125 = vmatpush3.bf16.msra.mxu0 %v2851_v17 }
  0x21   :  { %2126 = vmatprep.subr.bf16.mxu0 %v2728_v8  ;;  %2074 = vmatprep.mubr.msk.bf16.mxu0 %vm145_vm1, %v2683_v22 }
  0x23   :  { %2107 = vmatpush3.bf16.msra.mxu1 %v2863_v18 }
  0x24   :  { %2127 = vmatpush3.bf16.msra.mxu0 %v2863_v18  ;;  %2108 = vmatprep.subr.bf16.mxu1 %v2728_v8 }
  0x25   :  { %2128 = vmatprep.subr.bf16.mxu0 %v2728_v8 }
  0x27   :  { %2109 = vmatpush3.bf16.msra.mxu1 %v2872_v19  ;;  %2075 = vmatmul.mubr.msk.bf16.gmra.mrb[8].mxu0 %vm145_vm1, %v2684_v23 }
  0x28   :  { %2129 = vmatpush3.bf16.msra.mxu0 %v2872_v19  ;;  %2134 = vmatprep.subr.bf16.mxu1 %v2728_v8 }
  0x29   :  { %2154 = vmatprep.subr.bf16.mxu0 %v2728_v8  ;;  %2078 = vmatprep.mubr.msk.bf16.mxu0 %vm145_vm1, %v2685_v24 }
  0x2f   :  { %2079 = vmatmul.mubr.msk.bf16.gmra.mrb[12].mxu0 %vm145_vm1, %v2686_v25 }
  0x30   :  { %2130 = vmatprep.mubr.msk.bf16.mxu0 %vm2729_vm2, %v2728_v8 }
  0xdd   :  { %v2911_v27 = vpop.f32.mrb[0].mxu0  ;;  %v2913_v28 = vpop.f32.mrb[0].mxu1 }
  0xde   :  { %v226_v29 = vpop.f32.mrb[1].mxu0  ;;  %v2915_v30 = vpop.f32.mrb[1].mxu1  ;;  %v235_v2 = vadd.f32 %v2911_v27, %v2909_v26 }
  0xdf   :  { %v227_v31 = vadd.f32 %v2909_v26, %v226_v29  ;;  %v2918_v32 = vpop.f32.mrb[2].mxu0  ;;  %v2920_v33 = vpop.f32.mrb[2].mxu1 }
  0xe0   :  { %v229_v34 = vpop.f32.mrb[3].mxu0  ;;  %v2922_v35 = vpop.f32.mrb[3].mxu1  ;;  %v238_v15 = vadd.f32 %v2918_v32, %v2909_v26 }
  0xe1   :  { %v399_v36 = vmax.f32 %v227_v31, 0.0  ;;  %v230_v58 = vadd.f32 %v2909_v26, %v229_v34 }
  0xe3   :  { %v400_v37 = vpack.c.bf16 %v399_v36, %v399_v36 }
  0xe5   :  { %2111 = vmatmul.mubr.bf16.vlgmr.msra.gmra.mrb[12].mxu1 %v400_v37  ;;  %v2924_v38 = vpop.f32.mrb[4].mxu1 }
  0xe6   :  { %v2926_v39 = vpop.f32.mrb[5].mxu1  ;;  %2135 = vmatpush3.bf16.msra.mxu1 %v2789_v7  ;;  %2150 = vmatprep.mubr.msk.bf16.mxu1 %vm2729_vm2, %v2728_v8 }
  0xe7   :  { %v2931_v40 = vpop.f32.mrb[6].mxu1  ;;  %2136 = vmatprep.subr.bf16.mxu1 %v2728_v8 }
  0xe8   :  { %v2934_v41 = vpop.f32.mrb[7].mxu1 }
  0xea   :  { %2137 = vmatpush3.bf16.msra.mxu1 %v2802_v10 }
  0xeb   :  { %2138 = vmatprep.subr.bf16.mxu1 %v2728_v8 }
  0xed   :  { %v2938_v42 = vpop.f32.mrb[8].mxu1 }
  0xee   :  { %v2940_v43 = vpop.f32.mrb[9].mxu1  ;;  %2139 = vmatpush3.bf16.msra.mxu1 %v2810_v11 }
  0xef   :  { %v2943_v44 = vpop.f32.mrb[10].mxu1  ;;  %2140 = vmatprep.subr.bf16.mxu1 %v2728_v8 }
  0xf0   :  { %v2946_v45 = vpop.f32.mrb[11].mxu1 }
  0xf2   :  { %2141 = vmatpush3.bf16.msra.mxu1 %v2825_v14  ;;  %v2958_v46 = vpop.f32.mrb[4].mxu0 }
  0xf3   :  { %2142 = vmatprep.subr.bf16.mxu1 %v2728_v8  ;;  %v2960_v47 = vpop.f32.mrb[5].mxu0 }
  0xf4   :  { %v2962_v48 = vpop.f32.mrb[6].mxu0  ;;  %v243_v29 = vadd.f32 %v2909_v26, %v2960_v47 }
  0xf5   :  { %v2964_v49 = vpop.f32.mrb[7].mxu0 }
  0xf6   :  { %2143 = vmatpush3.bf16.msra.mxu1 %v2839_v16  ;;  %v246_v47 = vadd.f32 %v2909_v26, %v2964_v49  ;;  %v251_v49 = vadd.f32 %v2958_v46, %v2909_v26  ;;  %v254_v46 = vadd.f32 %v2962_v48, %v2909_v26 }
  0xf7   :  { %2144 = vmatprep.subr.bf16.mxu1 %v2728_v8 }
  0xfa   :  { %2145 = vmatpush3.bf16.msra.mxu1 %v2851_v17  ;;  %v2966_v50 = vpop.f32.mrb[8].mxu0 }
  0xfb   :  { %2146 = vmatprep.subr.bf16.mxu1 %v2728_v8  ;;  %v2968_v51 = vpop.f32.mrb[9].mxu0 }
  0xfc   :  { %v2970_v52 = vpop.f32.mrb[10].mxu0  ;;  %v259_v48 = vadd.f32 %v2909_v26, %v2968_v51 }
  0xfd   :  { %v2972_v53 = vpop.f32.mrb[11].mxu0 }
  0xfe   :  { %2147 = vmatpush3.bf16.msra.mxu1 %v2863_v18  ;;  %v262_v51 = vadd.f32 %v2909_v26, %v2972_v53  ;;  %v267_v53 = vadd.f32 %v2966_v50, %v2909_v26  ;;  %v270_v50 = vadd.f32 %v2970_v52, %v2909_v26 }
  0xff   :  { %2148 = vmatprep.subr.bf16.mxu1 %v2728_v8 }
 0x102   :  { %2149 = vmatpush3.bf16.msra.mxu1 %v2872_v19  ;;  %v2974_v54 = vpop.f32.mrb[12].mxu0 }
 0x103   :  { %2174 = vmatprep.subr.bf16.mxu1 %v2728_v8  ;;  %v2976_v55 = vpop.f32.mrb[13].mxu0 }
 0x104   :  { %v2978_v56 = vpop.f32.mrb[14].mxu0  ;;  %v275_v52 = vadd.f32 %v2909_v26, %v2976_v55 }
 0x105   :  { %v2980_v57 = vpop.f32.mrb[15].mxu0 }
 0x106   :  { %v278_v55 = vadd.f32 %v2909_v26, %v2980_v57 }
 0x1b8   :  { %v485_v59 = vpop.f32.mrb[12].mxu1 }
 0x1b9   :  { %v486_v60 = vadd.f32 %v485_v59, %v230_v58  ;;  %v2112_v61 = vpop.f32.mrb[13].mxu1 }
 0x1ba   :  { %v488_v62 = vpop.f32.mrb[14].mxu1 }
 0x1bb   :  { %v491_v63 = vmax.f32 %v486_v60, 0.0  ;;  %v2113_v0 = vpop.f32.mrb[15].mxu1 }
 0x1bd   :  { %v492_v1 = vpack.c.bf16 %v491_v63, %v491_v63 }
 0x1bf   :  { %2131 = vmatmul.mubr.bf16.vlgmr.msra.gmra.mrb[16].mxu0 %v492_v1 }
 0x1c0   :  { %2155 = vmatpush3.bf16.msra.mxu0 %v2789_v7  ;;  %2170 = vmatprep.mubr.msk.bf16.mxu0 %vm2729_vm2, %v2728_v8 }
 0x1c1   :  { %2156 = vmatprep.subr.bf16.mxu0 %v2728_v8 }
 0x1c4   :  { %2157 = vmatpush3.bf16.msra.mxu0 %v2802_v10 }
 0x1c5   :  { %2158 = vmatprep.subr.bf16.mxu0 %v2728_v8 }
 0x1c8   :  { %2159 = vmatpush3.bf16.msra.mxu0 %v2810_v11 }
 0x1c9   :  { %2160 = vmatprep.subr.bf16.mxu0 %v2728_v8 }
 0x1cc   :  { %2161 = vmatpush3.bf16.msra.mxu0 %v2825_v14 }
 0x1cd   :  { %2162 = vmatprep.subr.bf16.mxu0 %v2728_v8 }
 0x1d0   :  { %2163 = vmatpush3.bf16.msra.mxu0 %v2839_v16 }
 0x1d1   :  { %2164 = vmatprep.subr.bf16.mxu0 %v2728_v8 }
 0x1d4   :  { %2165 = vmatpush3.bf16.msra.mxu0 %v2851_v17 }
 0x1d5   :  { %2166 = vmatprep.subr.bf16.mxu0 %v2728_v8 }
 0x1d8   :  { %2167 = vmatpush3.bf16.msra.mxu0 %v2863_v18 }
 0x1d9   :  { %2168 = vmatprep.subr.bf16.mxu0 %v2728_v8 }
 0x1dc   :  { %2169 = vmatpush3.bf16.msra.mxu0 %v2872_v19 }
 0x1dd   :  { %2194 = vmatprep.subr.bf16.mxu0 %v2728_v8 }
 0x292   :  { %v529_v3 = vpop.f32.mrb[16].mxu0 }
 0x293   :  { %v530_v4 = vadd.f32 %v529_v3, %v235_v2  ;;  %v2132_v5 = vpop.f32.mrb[17].mxu0 }
 0x294   :  { %v532_v6 = vpop.f32.mrb[18].mxu0 }
 0x295   :  { %v535_v9 = vmax.f32 %v530_v4, 0.0  ;;  %v2133_v12 = vpop.f32.mrb[19].mxu0 }
 0x297   :  { %v536_v13 = vpack.c.bf16 %v535_v9, %v535_v9 }
 0x299   :  { %2151 = vmatmul.mubr.bf16.vlgmr.msra.gmra.mrb[16].mxu1 %v536_v13 }
 0x29a   :  { %2175 = vmatpush3.bf16.msra.mxu1 %v2789_v7  ;;  %2190 = vmatprep.mubr.msk.bf16.mxu1 %vm2729_vm2, %v2728_v8 }
 0x29b   :  { %2176 = vmatprep.subr.bf16.mxu1 %v2728_v8 }
 0x29e   :  { %2177 = vmatpush3.bf16.msra.mxu1 %v2802_v10 }
 0x29f   :  { %2178 = vmatprep.subr.bf16.mxu1 %v2728_v8 }
 0x2a2   :  { %2179 = vmatpush3.bf16.msra.mxu1 %v2810_v11 }
 0x2a3   :  { %2180 = vmatprep.subr.bf16.mxu1 %v2728_v8 }
 0x2a6   :  { %2181 = vmatpush3.bf16.msra.mxu1 %v2825_v14 }
 0x2a7   :  { %2182 = vmatprep.subr.bf16.mxu1 %v2728_v8 }
 0x2aa   :  { %2183 = vmatpush3.bf16.msra.mxu1 %v2839_v16 }
 0x2ab   :  { %2184 = vmatprep.subr.bf16.mxu1 %v2728_v8 }
 0x2ae   :  { %2185 = vmatpush3.bf16.msra.mxu1 %v2851_v17 }
 0x2af   :  { %2186 = vmatprep.subr.bf16.mxu1 %v2728_v8 }
 0x2b2   :  { %2187 = vmatpush3.bf16.msra.mxu1 %v2863_v18 }
 0x2b3   :  { %2188 = vmatprep.subr.bf16.mxu1 %v2728_v8 }
 0x2b6   :  { %2189 = vmatpush3.bf16.msra.mxu1 %v2872_v19 }
 0x2b7   :  { %2214 = vmatprep.subr.bf16.mxu1 %v2728_v8 }
 0x36c   :  { %v573_v20 = vpop.f32.mrb[16].mxu1 }
 0x36d   :  { %v574_v21 = vadd.f32 %v573_v20, %v238_v15  ;;  %v2152_v22 = vpop.f32.mrb[17].mxu1 }
 0x36e   :  { %v576_v23 = vpop.f32.mrb[18].mxu1 }
 0x36f   :  { %v579_v24 = vmax.f32 %v574_v21, 0.0  ;;  %v2153_v25 = vpop.f32.mrb[19].mxu1 }
 0x371   :  { %v580_v27 = vpack.c.bf16 %v579_v24, %v579_v24 }
 0x373   :  { %2171 = vmatmul.mubr.bf16.vlgmr.msra.gmra.mrb[20].mxu0 %v580_v27 }
 0x374   :  { %2195 = vmatpush3.bf16.msra.mxu0 %v2789_v7  ;;  %2210 = vmatprep.mubr.msk.bf16.mxu0 %vm2729_vm2, %v2728_v8 }
 0x375   :  { %2196 = vmatprep.subr.bf16.mxu0 %v2728_v8 }
 0x378   :  { %2197 = vmatpush3.bf16.msra.mxu0 %v2802_v10 }
 0x379   :  { %2198 = vmatprep.subr.bf16.mxu0 %v2728_v8 }
 0x37c   :  { %2199 = vmatpush3.bf16.msra.mxu0 %v2810_v11 }
 0x37d   :  { %2200 = vmatprep.subr.bf16.mxu0 %v2728_v8 }
 0x380   :  { %2201 = vmatpush3.bf16.msra.mxu0 %v2825_v14 }
 0x381   :  { %2202 = vmatprep.subr.bf16.mxu0 %v2728_v8 }
 0x384   :  { %2203 = vmatpush3.bf16.msra.mxu0 %v2839_v16 }
 0x385   :  { %2204 = vmatprep.subr.bf16.mxu0 %v2728_v8 }
 0x388   :  { %2205 = vmatpush3.bf16.msra.mxu0 %v2851_v17 }
 0x389   :  { %2206 = vmatprep.subr.bf16.mxu0 %v2728_v8 }
 0x38c   :  { %2207 = vmatpush3.bf16.msra.mxu0 %v2863_v18 }
 0x38d   :  { %2208 = vmatprep.subr.bf16.mxu0 %v2728_v8 }
 0x390   :  { %2209 = vmatpush3.bf16.msra.mxu0 %v2872_v19 }
 0x391   :  { %2234 = vmatprep.subr.bf16.mxu0 %v2728_v8 }
 0x446   :  { %v617_v31 = vpop.f32.mrb[20].mxu0 }
 0x447   :  { %v618_v32 = vadd.f32 %v617_v31, %v243_v29  ;;  %v2172_v34 = vpop.f32.mrb[21].mxu0 }
 0x448   :  { %v620_v36 = vpop.f32.mrb[22].mxu0 }
 0x449   :  { %v623_v37 = vmax.f32 %v618_v32, 0.0  ;;  %v2173_v58 = vpop.f32.mrb[23].mxu0 }
 0x44b   :  { %v624_v59 = vpack.c.bf16 %v623_v37, %v623_v37 }
 0x44d   :  { %2191 = vmatmul.mubr.bf16.vlgmr.msra.gmra.mrb[20].mxu1 %v624_v59 }
 0x44e   :  { %2215 = vmatpush3.bf16.msra.mxu1 %v2789_v7  ;;  %2230 = vmatprep.mubr.msk.bf16.mxu1 %vm2729_vm2, %v2728_v8 }
 0x44f   :  { %2216 = vmatprep.subr.bf16.mxu1 %v2728_v8 }
 0x452   :  { %2217 = vmatpush3.bf16.msra.mxu1 %v2802_v10 }
 0x453   :  { %2218 = vmatprep.subr.bf16.mxu1 %v2728_v8 }
 0x456   :  { %2219 = vmatpush3.bf16.msra.mxu1 %v2810_v11 }
 0x457   :  { %2220 = vmatprep.subr.bf16.mxu1 %v2728_v8 }
 0x45a   :  { %2221 = vmatpush3.bf16.msra.mxu1 %v2825_v14 }
 0x45b   :  { %2222 = vmatprep.subr.bf16.mxu1 %v2728_v8 }
 0x45e   :  { %2223 = vmatpush3.bf16.msra.mxu1 %v2839_v16 }
 0x45f   :  { %2224 = vmatprep.subr.bf16.mxu1 %v2728_v8 }
 0x462   :  { %2225 = vmatpush3.bf16.msra.mxu1 %v2851_v17 }
 0x463   :  { %2226 = vmatprep.subr.bf16.mxu1 %v2728_v8 }
 0x466   :  { %2227 = vmatpush3.bf16.msra.mxu1 %v2863_v18 }
 0x467   :  { %2228 = vmatprep.subr.bf16.mxu1 %v2728_v8 }
 0x46a   :  { %2229 = vmatpush3.bf16.msra.mxu1 %v2872_v19 }
 0x46b   :  { %2254 = vmatprep.subr.bf16.mxu1 %v2728_v8 }
 0x520   :  { %v661_v60 = vpop.f32.mrb[20].mxu1 }
 0x521   :  { %v662_v61 = vadd.f32 %v661_v60, %v246_v47  ;;  %v2192_v62 = vpop.f32.mrb[21].mxu1 }
 0x522   :  { %v664_v63 = vpop.f32.mrb[22].mxu1 }
 0x523   :  { %v667_v0 = vmax.f32 %v662_v61, 0.0  ;;  %v2193_v1 = vpop.f32.mrb[23].mxu1 }
 0x525   :  { %v668_v2 = vpack.c.bf16 %v667_v0, %v667_v0 }
 0x527   :  { %2211 = vmatmul.mubr.bf16.vlgmr.msra.gmra.mrb[24].mxu0 %v668_v2 }
 0x528   :  { %2235 = vmatpush3.bf16.msra.mxu0 %v2789_v7  ;;  %2250 = vmatprep.mubr.msk.bf16.mxu0 %vm2729_vm2, %v2728_v8 }
 0x529   :  { %2236 = vmatprep.subr.bf16.mxu0 %v2728_v8 }
 0x52c   :  { %2237 = vmatpush3.bf16.msra.mxu0 %v2802_v10 }
 0x52d   :  { %2238 = vmatprep.subr.bf16.mxu0 %v2728_v8 }
 0x530   :  { %2239 = vmatpush3.bf16.msra.mxu0 %v2810_v11 }
 0x531   :  { %2240 = vmatprep.subr.bf16.mxu0 %v2728_v8 }
 0x534   :  { %2241 = vmatpush3.bf16.msra.mxu0 %v2825_v14 }
 0x535   :  { %2242 = vmatprep.subr.bf16.mxu0 %v2728_v8 }
 0x538   :  { %2243 = vmatpush3.bf16.msra.mxu0 %v2839_v16 }
 0x539   :  { %2244 = vmatprep.subr.bf16.mxu0 %v2728_v8 }
 0x53c   :  { %2245 = vmatpush3.bf16.msra.mxu0 %v2851_v17 }
 0x53d   :  { %2246 = vmatprep.subr.bf16.mxu0 %v2728_v8 }
 0x540   :  { %2247 = vmatpush3.bf16.msra.mxu0 %v2863_v18 }
 0x541   :  { %2248 = vmatprep.subr.bf16.mxu0 %v2728_v8 }
 0x544   :  { %2249 = vmatpush3.bf16.msra.mxu0 %v2872_v19 }
 0x545   :  { %2274 = vmatprep.subr.bf16.mxu0 %v2728_v8 }
 0x5fa   :  { %v705_v3 = vpop.f32.mrb[24].mxu0 }
 0x5fb   :  { %v706_v4 = vadd.f32 %v705_v3, %v251_v49  ;;  %v2212_v5 = vpop.f32.mrb[25].mxu0 }
 0x5fc   :  { %v708_v6 = vpop.f32.mrb[26].mxu0 }
 0x5fd   :  { %v711_v9 = vmax.f32 %v706_v4, 0.0  ;;  %v2213_v12 = vpop.f32.mrb[27].mxu0 }
 0x5ff   :  { %v712_v13 = vpack.c.bf16 %v711_v9, %v711_v9 }
 0x601   :  { %2231 = vmatmul.mubr.bf16.vlgmr.msra.gmra.mrb[24].mxu1 %v712_v13 }
 0x602   :  { %2255 = vmatpush3.bf16.msra.mxu1 %v2789_v7  ;;  %2270 = vmatprep.mubr.msk.bf16.mxu1 %vm2729_vm2, %v2728_v8 }
 0x603   :  { %2256 = vmatprep.subr.bf16.mxu1 %v2728_v8 }
 0x606   :  { %2257 = vmatpush3.bf16.msra.mxu1 %v2802_v10 }
 0x607   :  { %2258 = vmatprep.subr.bf16.mxu1 %v2728_v8 }
 0x60a   :  { %2259 = vmatpush3.bf16.msra.mxu1 %v2810_v11 }
 0x60b   :  { %2260 = vmatprep.subr.bf16.mxu1 %v2728_v8 }
 0x60e   :  { %2261 = vmatpush3.bf16.msra.mxu1 %v2825_v14 }
 0x60f   :  { %2262 = vmatprep.subr.bf16.mxu1 %v2728_v8 }
 0x612   :  { %2263 = vmatpush3.bf16.msra.mxu1 %v2839_v16 }
 0x613   :  { %2264 = vmatprep.subr.bf16.mxu1 %v2728_v8 }
 0x616   :  { %2265 = vmatpush3.bf16.msra.mxu1 %v2851_v17 }
 0x617   :  { %2266 = vmatprep.subr.bf16.mxu1 %v2728_v8 }
 0x61a   :  { %2267 = vmatpush3.bf16.msra.mxu1 %v2863_v18 }
 0x61b   :  { %2268 = vmatprep.subr.bf16.mxu1 %v2728_v8 }
 0x61e   :  { %2269 = vmatpush3.bf16.msra.mxu1 %v2872_v19 }
 0x61f   :  { %2294 = vmatprep.subr.bf16.mxu1 %v2728_v8 }
 0x6d4   :  { %v749_v15 = vpop.f32.mrb[24].mxu1 }
 0x6d5   :  { %v750_v20 = vadd.f32 %v749_v15, %v254_v46  ;;  %v2232_v21 = vpop.f32.mrb[25].mxu1 }
 0x6d6   :  { %v752_v22 = vpop.f32.mrb[26].mxu1 }
 0x6d7   :  { %v755_v23 = vmax.f32 %v750_v20, 0.0  ;;  %v2233_v24 = vpop.f32.mrb[27].mxu1 }
 0x6d9   :  { %v756_v25 = vpack.c.bf16 %v755_v23, %v755_v23 }
 0x6db   :  { %2251 = vmatmul.mubr.bf16.vlgmr.msra.gmra.mrb[28].mxu0 %v756_v25 }
 0x6dc   :  { %2275 = vmatpush3.bf16.msra.mxu0 %v2789_v7  ;;  %2290 = vmatprep.mubr.msk.bf16.mxu0 %vm2729_vm2, %v2728_v8 }
 0x6dd   :  { %2276 = vmatprep.subr.bf16.mxu0 %v2728_v8 }
 0x6e0   :  { %2277 = vmatpush3.bf16.msra.mxu0 %v2802_v10 }
 0x6e1   :  { %2278 = vmatprep.subr.bf16.mxu0 %v2728_v8 }
 0x6e4   :  { %2279 = vmatpush3.bf16.msra.mxu0 %v2810_v11 }
 0x6e5   :  { %2280 = vmatprep.subr.bf16.mxu0 %v2728_v8 }
 0x6e8   :  { %2281 = vmatpush3.bf16.msra.mxu0 %v2825_v14 }
 0x6e9   :  { %2282 = vmatprep.subr.bf16.mxu0 %v2728_v8 }
 0x6ec   :  { %2283 = vmatpush3.bf16.msra.mxu0 %v2839_v16 }
 0x6ed   :  { %2284 = vmatprep.subr.bf16.mxu0 %v2728_v8 }
 0x6f0   :  { %2285 = vmatpush3.bf16.msra.mxu0 %v2851_v17 }
 0x6f1   :  { %2286 = vmatprep.subr.bf16.mxu0 %v2728_v8 }
 0x6f4   :  { %2287 = vmatpush3.bf16.msra.mxu0 %v2863_v18 }
 0x6f5   :  { %2288 = vmatprep.subr.bf16.mxu0 %v2728_v8 }
 0x6f8   :  { %2289 = vmatpush3.bf16.msra.mxu0 %v2872_v19 }
 0x6f9   :  { %2314 = vmatprep.subr.bf16.mxu0 %v2728_v8 }
 0x7ae   :  { %v793_v27 = vpop.f32.mrb[28].mxu0 }
 0x7af   :  { %v794_v29 = vadd.f32 %v793_v27, %v259_v48  ;;  %v2252_v31 = vpop.f32.mrb[29].mxu0 }
 0x7b0   :  { %v796_v32 = vpop.f32.mrb[30].mxu0 }
 0x7b1   :  { %v799_v34 = vmax.f32 %v794_v29, 0.0  ;;  %v2253_v36 = vpop.f32.mrb[31].mxu0 }
 0x7b3   :  { %v800_v37 = vpack.c.bf16 %v799_v34, %v799_v34 }
 0x7b5   :  { %2271 = vmatmul.mubr.bf16.vlgmr.msra.gmra.mrb[28].mxu1 %v800_v37 }
 0x7b6   :  { %2295 = vmatpush3.bf16.msra.mxu1 %v2789_v7  ;;  %2310 = vmatprep.mubr.msk.bf16.mxu1 %vm2729_vm2, %v2728_v8 }
 0x7b7   :  { %2296 = vmatprep.subr.bf16.mxu1 %v2728_v8 }
 0x7ba   :  { %2297 = vmatpush3.bf16.msra.mxu1 %v2802_v10 }
 0x7bb   :  { %2298 = vmatprep.subr.bf16.mxu1 %v2728_v8 }
 0x7be   :  { %2299 = vmatpush3.bf16.msra.mxu1 %v2810_v11 }
 0x7bf   :  { %2300 = vmatprep.subr.bf16.mxu1 %v2728_v8 }
 0x7c2   :  { %2301 = vmatpush3.bf16.msra.mxu1 %v2825_v14 }
 0x7c3   :  { %2302 = vmatprep.subr.bf16.mxu1 %v2728_v8 }
 0x7c6   :  { %2303 = vmatpush3.bf16.msra.mxu1 %v2839_v16 }
 0x7c7   :  { %2304 = vmatprep.subr.bf16.mxu1 %v2728_v8 }
 0x7ca   :  { %2305 = vmatpush3.bf16.msra.mxu1 %v2851_v17 }
 0x7cb   :  { %2306 = vmatprep.subr.bf16.mxu1 %v2728_v8 }
 0x7ce   :  { %2307 = vmatpush3.bf16.msra.mxu1 %v2863_v18 }
 0x7cf   :  { %2308 = vmatprep.subr.bf16.mxu1 %v2728_v8 }
 0x7d2   :  { %2309 = vmatpush3.bf16.msra.mxu1 %v2872_v19 }
 0x7d3   :  { %2334 = vmatprep.subr.bf16.mxu1 %v2728_v8 }
 0x888   :  { %v837_v58 = vpop.f32.mrb[28].mxu1 }
 0x889   :  { %v838_v59 = vadd.f32 %v837_v58, %v262_v51  ;;  %v2272_v47 = vpop.f32.mrb[29].mxu1 }
 0x88a   :  { %v840_v60 = vpop.f32.mrb[30].mxu1 }
 0x88b   :  { %v843_v61 = vmax.f32 %v838_v59, 0.0  ;;  %v2273_v62 = vpop.f32.mrb[31].mxu1 }
 0x88d   :  { %v844_v63 = vpack.c.bf16 %v843_v61, %v843_v61 }
 0x88f   :  { %2291 = vmatmul.mubr.bf16.vlgmr.msra.gmra.mrb[32].mxu0 %v844_v63  ;;  %v3246_v63 = vld [vmem:[%s3561_s2] sm:$0xff]  }
 0x890   :  { %2315 = vmatpush3.bf16.msra.mxu0 %v2789_v7  ;;  %2330 = vmatprep.mubr.msk.bf16.mxu0 %vm2729_vm2, %v2728_v8 }
 0x891   :  { %2316 = vmatprep.subr.bf16.mxu0 %v2728_v8 }
 0x894   :  { %2317 = vmatpush3.bf16.msra.mxu0 %v2802_v10 }
 0x895   :  { %2318 = vmatprep.subr.bf16.mxu0 %v2728_v8 }
 0x898   :  { %2319 = vmatpush3.bf16.msra.mxu0 %v2810_v11 }
 0x899   :  { %2320 = vmatprep.subr.bf16.mxu0 %v2728_v8 }
 0x89c   :  { %2321 = vmatpush3.bf16.msra.mxu0 %v2825_v14 }
 0x89d   :  { %2322 = vmatprep.subr.bf16.mxu0 %v2728_v8 }
 0x8a0   :  { %2323 = vmatpush3.bf16.msra.mxu0 %v2839_v16 }
 0x8a1   :  { %2324 = vmatprep.subr.bf16.mxu0 %v2728_v8 }
 0x8a4   :  { %2325 = vmatpush3.bf16.msra.mxu0 %v2851_v17 }
 0x8a5   :  { %2326 = vmatprep.subr.bf16.mxu0 %v2728_v8 }
 0x8a8   :  { %2327 = vmatpush3.bf16.msra.mxu0 %v2863_v18 }
 0x8a9   :  { %2328 = vmatprep.subr.bf16.mxu0 %v2728_v8 }
 0x8ac   :  { %2329 = vmatpush3.bf16.msra.mxu0 %v2872_v19 }
 0x8ad   :  { %2354 = vmatprep.subr.bf16.mxu0 %v2728_v8 }
 0x962   :  { %v881_v0 = vpop.f32.mrb[32].mxu0 }
 0x963   :  { %v882_v1 = vadd.f32 %v881_v0, %v267_v53  ;;  %v2292_v2 = vpop.f32.mrb[33].mxu0 }
 0x964   :  { %v884_v49 = vpop.f32.mrb[34].mxu0 }
 0x965   :  { %v887_v3 = vmax.f32 %v882_v1, 0.0  ;;  %v2293_v4 = vpop.f32.mrb[35].mxu0 }
 0x967   :  { %v888_v5 = vpack.c.bf16 %v887_v3, %v887_v3  ;;  %v3275_v3 = vld [vmem:[%s3561_s2 + $0x8] sm:$0xff]  }
 0x969   :  { %2311 = vmatmul.mubr.bf16.vlgmr.msra.gmra.mrb[32].mxu1 %v888_v5 }
 0x96a   :  { %2335 = vmatpush3.bf16.msra.mxu1 %v2789_v7  ;;  %2350 = vmatprep.mubr.msk.bf16.mxu1 %vm2729_vm2, %v2728_v8 }
 0x96b   :  { %2336 = vmatprep.subr.bf16.mxu1 %v2728_v8 }
 0x96e   :  { %2337 = vmatpush3.bf16.msra.mxu1 %v2802_v10 }
 0x96f   :  { %2338 = vmatprep.subr.bf16.mxu1 %v2728_v8 }
 0x972   :  { %2339 = vmatpush3.bf16.msra.mxu1 %v2810_v11 }
 0x973   :  { %2340 = vmatprep.subr.bf16.mxu1 %v2728_v8 }
 0x976   :  { %2341 = vmatpush3.bf16.msra.mxu1 %v2825_v14 }
 0x977   :  { %2342 = vmatprep.subr.bf16.mxu1 %v2728_v8 }
 0x97a   :  { %2343 = vmatpush3.bf16.msra.mxu1 %v2839_v16 }
 0x97b   :  { %2344 = vmatprep.subr.bf16.mxu1 %v2728_v8 }
 0x97e   :  { %2345 = vmatpush3.bf16.msra.mxu1 %v2851_v17 }
 0x97f   :  { %2346 = vmatprep.subr.bf16.mxu1 %v2728_v8 }
 0x982   :  { %2347 = vmatpush3.bf16.msra.mxu1 %v2863_v18 }
 0x983   :  { %2348 = vmatprep.subr.bf16.mxu1 %v2728_v8 }
 0x986   :  { %2349 = vmatpush3.bf16.msra.mxu1 %v2872_v19 }
 0x987   :  { %2374 = vmatprep.subr.bf16.mxu1 %v2728_v8 }
 0xa3c   :  { %v925_v6 = vpop.f32.mrb[32].mxu1 }
 0xa3d   :  { %v926_v9 = vadd.f32 %v925_v6, %v270_v50  ;;  %v2312_v12 = vpop.f32.mrb[33].mxu1 }
 0xa3e   :  { %v928_v13 = vpop.f32.mrb[34].mxu1 }
 0xa3f   :  { %v931_v46 = vmax.f32 %v926_v9, 0.0  ;;  %v2313_v15 = vpop.f32.mrb[35].mxu1  ;;  %v3316_v13 = vld [vmem:[%s3561_s2 + $0x20] sm:$0xff]  }
 0xa41   :  { %v932_v20 = vpack.c.bf16 %v931_v46, %v931_v46  ;;  %v294_v46 = vadd.f32 %v2909_v26, %v2922_v35  ;;  %v3350_v35 = vld [vmem:[%s3561_s2 + $0x30] sm:$0xff]  }
 0xa43   :  { %2331 = vmatmul.mubr.bf16.vlgmr.msra.gmra.mrb[36].mxu0 %v932_v20 }
 0xa44   :  { %2355 = vmatpush3.bf16.msra.mxu0 %v2789_v7  ;;  %2370 = vmatprep.mubr.msk.bf16.mxu0 %vm2729_vm2, %v2728_v8 }
 0xa45   :  { %2356 = vmatprep.subr.bf16.mxu0 %v2728_v8 }
 0xa48   :  { %2357 = vmatpush3.bf16.msra.mxu0 %v2802_v10 }
 0xa49   :  { %2358 = vmatprep.subr.bf16.mxu0 %v2728_v8 }
 0xa4c   :  { %2359 = vmatpush3.bf16.msra.mxu0 %v2810_v11 }
 0xa4d   :  { %2360 = vmatprep.subr.bf16.mxu0 %v2728_v8 }
 0xa50   :  { %2361 = vmatpush3.bf16.msra.mxu0 %v2825_v14 }
 0xa51   :  { %2362 = vmatprep.subr.bf16.mxu0 %v2728_v8 }
 0xa54   :  { %2363 = vmatpush3.bf16.msra.mxu0 %v2839_v16 }
 0xa55   :  { %2364 = vmatprep.subr.bf16.mxu0 %v2728_v8 }
 0xa58   :  { %2365 = vmatpush3.bf16.msra.mxu0 %v2851_v17 }
 0xa59   :  { %2366 = vmatprep.subr.bf16.mxu0 %v2728_v8 }
 0xa5c   :  { %2367 = vmatpush3.bf16.msra.mxu0 %v2863_v18 }
 0xa5d   :  { %2368 = vmatprep.subr.bf16.mxu0 %v2728_v8 }
 0xa60   :  { %2369 = vmatpush3.bf16.msra.mxu0 %v2872_v19 }
 0xa61   :  { %2394 = vmatprep.subr.bf16.mxu0 %v2728_v8 }
 0xb16   :  { %v969_v21 = vpop.f32.mrb[36].mxu0 }
 0xb17   :  { %v970_v22 = vadd.f32 %v969_v21, %v275_v52  ;;  %v2332_v23 = vpop.f32.mrb[37].mxu0 }
 0xb18   :  { %v972_v24 = vpop.f32.mrb[38].mxu0 }
 0xb19   :  { %v975_v25 = vmax.f32 %v970_v22, 0.0  ;;  %v2333_v48 = vpop.f32.mrb[39].mxu0  ;;  %v299_v24 = vadd.f32 %v2913_v28, %v2909_v26 }
 0xb1b   :  { %v976_v27 = vpack.c.bf16 %v975_v25, %v975_v25 }
 0xb1d   :  { %2351 = vmatmul.mubr.bf16.vlgmr.msra.gmra.mrb[36].mxu1 %v976_v27 }
 0xb1e   :  { %2375 = vmatpush3.bf16.msra.mxu1 %v2789_v7  ;;  %2390 = vmatprep.mubr.msk.bf16.mxu1 %vm2729_vm2, %v2728_v8 }
 0xb1f   :  { %2376 = vmatprep.subr.bf16.mxu1 %v2728_v8 }
 0xb22   :  { %2377 = vmatpush3.bf16.msra.mxu1 %v2802_v10 }
 0xb23   :  { %2378 = vmatprep.subr.bf16.mxu1 %v2728_v8 }
 0xb26   :  { %2379 = vmatpush3.bf16.msra.mxu1 %v2810_v11 }
 0xb27   :  { %2380 = vmatprep.subr.bf16.mxu1 %v2728_v8 }
 0xb2a   :  { %2381 = vmatpush3.bf16.msra.mxu1 %v2825_v14 }
 0xb2b   :  { %2382 = vmatprep.subr.bf16.mxu1 %v2728_v8 }
 0xb2e   :  { %2383 = vmatpush3.bf16.msra.mxu1 %v2839_v16 }
 0xb2f   :  { %2384 = vmatprep.subr.bf16.mxu1 %v2728_v8 }
 0xb32   :  { %2385 = vmatpush3.bf16.msra.mxu1 %v2851_v17 }
 0xb33   :  { %2386 = vmatprep.subr.bf16.mxu1 %v2728_v8 }
 0xb36   :  { %2387 = vmatpush3.bf16.msra.mxu1 %v2863_v18 }
 0xb37   :  { %2388 = vmatprep.subr.bf16.mxu1 %v2728_v8 }
 0xb3a   :  { %2389 = vmatpush3.bf16.msra.mxu1 %v2872_v19 }
 0xb3b   :  { %2414 = vmatprep.subr.bf16.mxu1 %v2728_v8 }
 0xbf0   :  { %v1013_v29 = vpop.f32.mrb[36].mxu1 }
 0xbf1   :  { %v1014_v31 = vadd.f32 %v1013_v29, %v278_v55  ;;  %v2352_v32 = vpop.f32.mrb[37].mxu1 }
 0xbf2   :  { %v1016_v34 = vpop.f32.mrb[38].mxu1 }
 0xbf3   :  { %v1019_v36 = vmax.f32 %v1014_v31, 0.0  ;;  %v2353_v37 = vpop.f32.mrb[39].mxu1 }
 0xbf5   :  { %v1020_v51 = vpack.c.bf16 %v1019_v36, %v1019_v36 }
 0xbf7   :  { %2371 = vmatmul.mubr.bf16.vlgmr.msra.gmra.mrb[40].mxu0 %v1020_v51 }
 0xbf8   :  { %2395 = vmatpush3.bf16.msra.mxu0 %v2789_v7  ;;  %2410 = vmatprep.mubr.msk.bf16.mxu0 %vm2729_vm2, %v2728_v8  ;;  %v283_v7 = vadd.f32 %v2974_v54, %v2909_v26 }
 0xbf9   :  { %2396 = vmatprep.subr.bf16.mxu0 %v2728_v8 }
 0xbfc   :  { %2397 = vmatpush3.bf16.msra.mxu0 %v2802_v10 }
 0xbfd   :  { %2398 = vmatprep.subr.bf16.mxu0 %v2728_v8 }
 0xc00   :  { %2399 = vmatpush3.bf16.msra.mxu0 %v2810_v11 }
 0xc01   :  { %2400 = vmatprep.subr.bf16.mxu0 %v2728_v8 }
 0xc04   :  { %2401 = vmatpush3.bf16.msra.mxu0 %v2825_v14 }
 0xc05   :  { %2402 = vmatprep.subr.bf16.mxu0 %v2728_v8 }
 0xc08   :  { %2403 = vmatpush3.bf16.msra.mxu0 %v2839_v16 }
 0xc09   :  { %2404 = vmatprep.subr.bf16.mxu0 %v2728_v8 }
 0xc0c   :  { %2405 = vmatpush3.bf16.msra.mxu0 %v2851_v17 }
 0xc0d   :  { %2406 = vmatprep.subr.bf16.mxu0 %v2728_v8 }
 0xc10   :  { %2407 = vmatpush3.bf16.msra.mxu0 %v2863_v18 }
 0xc11   :  { %2408 = vmatprep.subr.bf16.mxu0 %v2728_v8 }
 0xc14   :  { %2409 = vmatpush3.bf16.msra.mxu0 %v2872_v19 }
 0xc15   :  { %2434 = vmatprep.subr.bf16.mxu0 %v2728_v8 }
 0xcca   :  { %v1057_v57 = vpop.f32.mrb[40].mxu0 }
 0xccb   :  { %v1058_v58 = vadd.f32 %v1057_v57, %v283_v7  ;;  %v2372_v59 = vpop.f32.mrb[41].mxu0 }
 0xccc   :  { %v1060_v47 = vpop.f32.mrb[42].mxu0 }
 0xccd   :  { %v1063_v60 = vmax.f32 %v1058_v58, 0.0  ;;  %v2373_v61 = vpop.f32.mrb[43].mxu0 }
 0xccf   :  { %v1064_v62 = vpack.c.bf16 %v1063_v60, %v1063_v60 }
 0xcd1   :  { %2391 = vmatmul.mubr.bf16.vlgmr.msra.gmra.mrb[40].mxu1 %v1064_v62 }
 0xcd2   :  { %2415 = vmatpush3.bf16.msra.mxu1 %v3246_v63  ;;  %2430 = vmatprep.mubr.msk.bf16.mxu1 %vm2729_vm2, %v2728_v8 }
 0xcd3   :  { %2416 = vmatprep.subr.bf16.mxu1 %v2728_v8 }
 0xcd6   :  { %2417 = vmatpush3.bf16.msra.mxu1 %v2802_v10  ;;  %v286_v10 = vadd.f32 %v2978_v56, %v2909_v26  ;;  %v3282_v56 = vld [vmem:[%s3561_s2 + $0x10] sm:$0xff]  }
 0xcd7   :  { %2418 = vmatprep.subr.bf16.mxu1 %v2728_v8 }
 0xcda   :  { %2419 = vmatpush3.bf16.msra.mxu1 %v2810_v11 }
 0xcdb   :  { %2420 = vmatprep.subr.bf16.mxu1 %v2728_v8 }
 0xcde   :  { %2421 = vmatpush3.bf16.msra.mxu1 %v2825_v14 }
 0xcdf   :  { %2422 = vmatprep.subr.bf16.mxu1 %v2728_v8 }
 0xce2   :  { %2423 = vmatpush3.bf16.msra.mxu1 %v2839_v16 }
 0xce3   :  { %2424 = vmatprep.subr.bf16.mxu1 %v2728_v8 }
 0xce6   :  { %2425 = vmatpush3.bf16.msra.mxu1 %v2851_v17 }
 0xce7   :  { %2426 = vmatprep.subr.bf16.mxu1 %v2728_v8 }
 0xcea   :  { %2427 = vmatpush3.bf16.msra.mxu1 %v2863_v18 }
 0xceb   :  { %2428 = vmatprep.subr.bf16.mxu1 %v2728_v8 }
 0xcee   :  { %2429 = vmatpush3.bf16.msra.mxu1 %v2872_v19 }
 0xcef   :  { %2454 = vmatprep.subr.bf16.mxu1 %v2728_v8 }
 0xda4   :  { %v1101_v11 = vpop.f32.mrb[40].mxu1 }
 0xda5   :  { %v1102_v54 = vadd.f32 %v1101_v11, %v286_v10  ;;  %v2392_v53 = vpop.f32.mrb[41].mxu1 }
 0xda6   :  { %v1104_v0 = vpop.f32.mrb[42].mxu1 }
 0xda7   :  { %v1107_v1 = vmax.f32 %v1102_v54, 0.0  ;;  %v2393_v2 = vpop.f32.mrb[43].mxu1 }
 0xda9   :  { %v1108_v49 = vpack.c.bf16 %v1107_v1, %v1107_v1 }
 0xdab   :  { %2411 = vmatmul.mubr.bf16.vlgmr.msra.gmra.mrb[44].mxu0 %v1108_v49 }
 0xdac   :  { %2435 = vmatpush3.bf16.msra.mxu0 %v3246_v63  ;;  %2450 = vmatprep.mubr.msk.bf16.mxu0 %vm2729_vm2, %v2728_v8 }
 0xdad   :  { %2436 = vmatprep.subr.bf16.mxu0 %v2728_v8 }
 0xdb0   :  { %2437 = vmatpush3.bf16.msra.mxu0 %v3275_v3 }
 0xdb1   :  { %2438 = vmatprep.subr.bf16.mxu0 %v2728_v8 }
 0xdb4   :  { %2439 = vmatpush3.bf16.msra.mxu0 %v3282_v56 }
 0xdb5   :  { %2440 = vmatprep.subr.bf16.mxu0 %v2728_v8 }
 0xdb8   :  { %2441 = vmatpush3.bf16.msra.mxu0 %v2825_v14  ;;  %v291_v14 = vadd.f32 %v2909_v26, %v2915_v30  ;;  %v3309_v30 = vld [vmem:[%s3561_s2 + $0x18] sm:$0xff]   ;;  %v3384_v26 = vld [vmem:[%s3562_s3] ss:$0 sm:$0xff] }
 0xdb9   :  { %2442 = vmatprep.subr.bf16.mxu0 %v2728_v8  ;;  %v302_v28 = vadd.f32 %v3384_v26, %v2920_v33  ;;  %v307_v33 = vadd.f32 %v3384_v26, %v2926_v39  ;;  %v310_v39 = vadd.f32 %v3384_v26, %v2934_v41  ;;  %v315_v41 = vadd.f32 %v3384_v26, %v2924_v38 }
 0xdba   :  { %v318_v38 = vadd.f32 %v3384_v26, %v2931_v40  ;;  %v323_v40 = vadd.f32 %v3384_v26, %v2940_v43  ;;  %v326_v43 = vadd.f32 %v3384_v26, %v2946_v45  ;;  %v2688_v45 = vld [vmem:[%s3563_s4 + $0x8] sm:$0xff]  }
 0xdbc   :  { %2443 = vmatpush3.bf16.msra.mxu0 %v2839_v16 }
 0xdbd   :  { %2444 = vmatprep.subr.bf16.mxu0 %v2728_v8 }
 0xdc0   :  { %2445 = vmatpush3.bf16.msra.mxu0 %v2851_v17 }
 0xdc1   :  { %2446 = vmatprep.subr.bf16.mxu0 %v2728_v8 }
 0xdc4   :  { %2447 = vmatpush3.bf16.msra.mxu0 %v2863_v18 }
 0xdc5   :  { %2448 = vmatprep.subr.bf16.mxu0 %v2728_v8 }
 0xdc8   :  { %2449 = vmatpush3.bf16.msra.mxu0 %v2872_v19 }
 0xdc9   :  { %2474 = vmatprep.subr.bf16.mxu0 %v2728_v8 }
 0xe7e   :  { %v1145_v4 = vpop.f32.mrb[44].mxu0 }
 0xe7f   :  { %v1146_v5 = vadd.f32 %v1145_v4, %v291_v14  ;;  %v2412_v16 = vpop.f32.mrb[45].mxu0 }
 0xe80   :  { %v1148_v50 = vpop.f32.mrb[46].mxu0 }
 0xe81   :  { %v1151_v6 = vmax.f32 %v1146_v5, 0.0  ;;  %v2413_v9 = vpop.f32.mrb[47].mxu0 }
 0xe83   :  { %v1152_v12 = vpack.c.bf16 %v1151_v6, %v1151_v6 }
 0xe85   :  { %2431 = vmatmul.mubr.bf16.vlgmr.msra.gmra.mrb[44].mxu1 %v1152_v12 }
 0xe86   :  { %2455 = vmatpush3.bf16.msra.mxu1 %v3246_v63  ;;  %2470 = vmatprep.mubr.msk.bf16.mxu1 %vm2729_vm2, %v2728_v8 }
 0xe87   :  { %2456 = vmatprep.subr.bf16.mxu1 %v2728_v8 }
 0xe8a   :  { %2457 = vmatpush3.bf16.msra.mxu1 %v3275_v3 }
 0xe8b   :  { %2458 = vmatprep.subr.bf16.mxu1 %v2728_v8 }
 0xe8e   :  { %2459 = vmatpush3.bf16.msra.mxu1 %v3282_v56 }
 0xe8f   :  { %2460 = vmatprep.subr.bf16.mxu1 %v2728_v8 }
 0xe92   :  { %2461 = vmatpush3.bf16.msra.mxu1 %v3309_v30 }
 0xe93   :  { %2462 = vmatprep.subr.bf16.mxu1 %v2728_v8 }
 0xe96   :  { %2463 = vmatpush3.bf16.msra.mxu1 %v3316_v13 }
 0xe97   :  { %2464 = vmatprep.subr.bf16.mxu1 %v2728_v8 }
 0xe9a   :  { %2465 = vmatpush3.bf16.msra.mxu1 %v2851_v17 }
 0xe9b   :  { %2466 = vmatprep.subr.bf16.mxu1 %v2728_v8 }
 0xe9e   :  { %2467 = vmatpush3.bf16.msra.mxu1 %v2863_v18  ;;  %v3343_v18 = vld [vmem:[%s3561_s2 + $0x28] sm:$0xff]  }
 0xe9f   :  { %2468 = vmatprep.subr.bf16.mxu1 %v2728_v8 }
 0xea2   :  { %2469 = vmatpush3.bf16.msra.mxu1 %v2872_v19 }
 0xea3   :  { %2494 = vmatprep.subr.bf16.mxu1 %v2728_v8 }
 0xf58   :  { %v1189_v15 = vpop.f32.mrb[44].mxu1 }
 0xf59   :  { %v1190_v20 = vadd.f32 %v1189_v15, %v294_v46  ;;  %v2432_v52 = vpop.f32.mrb[45].mxu1 }
 0xf5a   :  { %v1192_v21 = vpop.f32.mrb[46].mxu1 }
 0xf5b   :  { %v1195_v22 = vmax.f32 %v1190_v20, 0.0  ;;  %v2433_v23 = vpop.f32.mrb[47].mxu1 }
 0xf5d   :  { %v1196_v17 = vpack.c.bf16 %v1195_v22, %v1195_v22 }
 0xf5f   :  { %2451 = vmatmul.mubr.bf16.vlgmr.msra.gmra.mrb[48].mxu0 %v1196_v17 }
 0xf60   :  { %2475 = vmatpush3.bf16.msra.mxu0 %v3246_v63  ;;  %2490 = vmatprep.mubr.msk.bf16.mxu0 %vm2729_vm2, %v2728_v8 }
 0xf61   :  { %2476 = vmatprep.subr.bf16.mxu0 %v2728_v8 }
 0xf64   :  { %2477 = vmatpush3.bf16.msra.mxu0 %v3275_v3 }
 0xf65   :  { %2478 = vmatprep.subr.bf16.mxu0 %v2728_v8 }
 0xf68   :  { %2479 = vmatpush3.bf16.msra.mxu0 %v3282_v56 }
 0xf69   :  { %2480 = vmatprep.subr.bf16.mxu0 %v2728_v8 }
 0xf6c   :  { %2481 = vmatpush3.bf16.msra.mxu0 %v3309_v30 }
 0xf6d   :  { %2482 = vmatprep.subr.bf16.mxu0 %v2728_v8 }
 0xf70   :  { %2483 = vmatpush3.bf16.msra.mxu0 %v3316_v13 }
 0xf71   :  { %2484 = vmatprep.subr.bf16.mxu0 %v2728_v8 }
 0xf74   :  { %2485 = vmatpush3.bf16.msra.mxu0 %v3343_v18 }
 0xf75   :  { %2486 = vmatprep.subr.bf16.mxu0 %v2728_v8 }
 0xf78   :  { %2487 = vmatpush3.bf16.msra.mxu0 %v3350_v35 }
 0xf79   :  { %2488 = vmatprep.subr.bf16.mxu0 %v2728_v8 }
 0xf7c   :  { %2489 = vmatpush3.bf16.msra.mxu0 %v2872_v19  ;;  %v3377_v19 = vld [vmem:[%s3561_s2 + $0x38] sm:$0xff]  }
 0xf7d   :  { %2514 = vmatprep.subr.bf16.mxu0 %v2728_v8 }
0x1032   :  { %v1233_v25 = vpop.f32.mrb[48].mxu0 }
0x1033   :  { %v1234_v48 = vadd.f32 %v1233_v25, %v299_v24  ;;  %v2452_v27 = vpop.f32.mrb[49].mxu0 }
0x1034   :  { %v1236_v55 = vpop.f32.mrb[50].mxu0 }
0x1035   :  { %v1239_v29 = vmax.f32 %v1234_v48, 0.0  ;;  %v2453_v31 = vpop.f32.mrb[51].mxu0 }
0x1037   :  { %v1240_v32 = vpack.c.bf16 %v1239_v29, %v1239_v29 }
0x1039   :  { %2471 = vmatmul.mubr.bf16.vlgmr.msra.gmra.mrb[48].mxu1 %v1240_v32 }
0x103a   :  { %2495 = vmatpush3.bf16.msra.mxu1 %v3246_v63  ;;  %2510 = vmatprep.mubr.msk.bf16.mxu1 %vm2729_vm2, %v2728_v8 }
0x103b   :  { %2496 = vmatprep.subr.bf16.mxu1 %v2728_v8 }
0x103e   :  { %2497 = vmatpush3.bf16.msra.mxu1 %v3275_v3 }
0x103f   :  { %2498 = vmatprep.subr.bf16.mxu1 %v2728_v8 }
0x1042   :  { %2499 = vmatpush3.bf16.msra.mxu1 %v3282_v56 }
0x1043   :  { %2500 = vmatprep.subr.bf16.mxu1 %v2728_v8 }
0x1046   :  { %2501 = vmatpush3.bf16.msra.mxu1 %v3309_v30 }
0x1047   :  { %2502 = vmatprep.subr.bf16.mxu1 %v2728_v8 }
0x104a   :  { %2503 = vmatpush3.bf16.msra.mxu1 %v3316_v13 }
0x104b   :  { %2504 = vmatprep.subr.bf16.mxu1 %v2728_v8 }
0x104e   :  { %2505 = vmatpush3.bf16.msra.mxu1 %v3343_v18 }
0x104f   :  { %2506 = vmatprep.subr.bf16.mxu1 %v2728_v8 }
0x1052   :  { %2507 = vmatpush3.bf16.msra.mxu1 %v3350_v35 }
0x1053   :  { %2508 = vmatprep.subr.bf16.mxu1 %v2728_v8 }
0x1056   :  { %2509 = vmatpush3.bf16.msra.mxu1 %v3377_v19 }
0x1057   :  { %2534 = vmatprep.subr.bf16.mxu1 %v2728_v8 }
0x110c   :  { %v1277_v34 = vpop.f32.mrb[48].mxu1 }
0x110d   :  { %v1278_v36 = vadd.f32 %v1277_v34, %v302_v28  ;;  %v2472_v37 = vpop.f32.mrb[49].mxu1  ;;  %v2691_v28 = vld [vmem:[%s3563_s4 + $0x20] sm:$0xff]   ;;  %v2692_v34 = vld [vmem:[%s3563_s4 + $0x28] sm:$0xff]  }
0x110e   :  { %v1280_v51 = vpop.f32.mrb[50].mxu1 }
0x110f   :  { %v1283_v7 = vmax.f32 %v1278_v36, 0.0  ;;  %v2473_v57 = vpop.f32.mrb[51].mxu1  ;;  %v331_v36 = vadd.f32 %v3384_v26, %v2938_v42  ;;  %v334_v42 = vadd.f32 %v3384_v26, %v2943_v44 }
0x1111   :  { %v1284_v58 = vpack.c.bf16 %v1283_v7, %v1283_v7 }
0x1113   :  { %2491 = vmatmul.mubr.bf16.vlgmr.msra.gmra.mrb[52].mxu0 %v1284_v58 }
0x1114   :  { %2515 = vmatpush3.bf16.msra.mxu0 %v3246_v63  ;;  %2530 = vmatprep.mubr.msk.bf16.mxu0 %vm2729_vm2, %v2728_v8 }
0x1115   :  { %2516 = vmatprep.subr.bf16.mxu0 %v2728_v8 }
0x1118   :  { %2517 = vmatpush3.bf16.msra.mxu0 %v3275_v3 }
0x1119   :  { %2518 = vmatprep.subr.bf16.mxu0 %v2728_v8 }
0x111c   :  { %2519 = vmatpush3.bf16.msra.mxu0 %v3282_v56 }
0x111d   :  { %2520 = vmatprep.subr.bf16.mxu0 %v2728_v8 }
0x1120   :  { %2521 = vmatpush3.bf16.msra.mxu0 %v3309_v30 }
0x1121   :  { %2522 = vmatprep.subr.bf16.mxu0 %v2728_v8 }
0x1124   :  { %2523 = vmatpush3.bf16.msra.mxu0 %v3316_v13 }
0x1125   :  { %2524 = vmatprep.subr.bf16.mxu0 %v2728_v8 }
0x1128   :  { %2525 = vmatpush3.bf16.msra.mxu0 %v3343_v18 }
0x1129   :  { %2526 = vmatprep.subr.bf16.mxu0 %v2728_v8 }
0x112c   :  { %2527 = vmatpush3.bf16.msra.mxu0 %v3350_v35 }
0x112d   :  { %2528 = vmatprep.subr.bf16.mxu0 %v2728_v8 }
0x1130   :  { %2529 = vmatpush3.bf16.msra.mxu0 %v3377_v19 }
0x1131   :  { %2554 = vmatprep.subr.bf16.mxu0 %v2728_v8 }
0x11e6   :  { %v1321_v59 = vpop.f32.mrb[52].mxu0 }
0x11e7   :  { %v1322_v47 = vadd.f32 %v1321_v59, %v307_v33  ;;  %v2492_v60 = vpop.f32.mrb[53].mxu0 }
0x11e8   :  { %v1324_v61 = vpop.f32.mrb[54].mxu0  ;;  %v2694_v60 = vld [vmem:[%s3563_s4 + $0x38] sm:$0xff]  }
0x11e9   :  { %v1327_v62 = vmax.f32 %v1322_v47, 0.0  ;;  %v2493_v10 = vpop.f32.mrb[55].mxu0  ;;  %v2693_v47 = vld [vmem:[%s3563_s4 + $0x30] sm:$0xff]  }
0x11eb   :  { %v1328_v11 = vpack.c.bf16 %v1327_v62, %v1327_v62 }
0x11ed   :  { %2511 = vmatmul.mubr.bf16.vlgmr.msra.gmra.mrb[52].mxu1 %v1328_v11 }
0x11ee   :  { %2535 = vmatpush3.bf16.msra.mxu1 %v3246_v63  ;;  %2550 = vmatprep.mubr.msk.bf16.mxu1 %vm2729_vm2, %v2728_v8 }
0x11ef   :  { %2536 = vmatprep.subr.bf16.mxu1 %v2728_v8 }
0x11f2   :  { %2537 = vmatpush3.bf16.msra.mxu1 %v3275_v3 }
0x11f3   :  { %2538 = vmatprep.subr.bf16.mxu1 %v2728_v8 }
0x11f6   :  { %2539 = vmatpush3.bf16.msra.mxu1 %v3282_v56 }
0x11f7   :  { %2540 = vmatprep.subr.bf16.mxu1 %v2728_v8 }
0x11fa   :  { %2541 = vmatpush3.bf16.msra.mxu1 %v3309_v30 }
0x11fb   :  { %2542 = vmatprep.subr.bf16.mxu1 %v2728_v8 }
0x11fe   :  { %2543 = vmatpush3.bf16.msra.mxu1 %v3316_v13 }
0x11ff   :  { %2544 = vmatprep.subr.bf16.mxu1 %v2728_v8 }
0x1202   :  { %2545 = vmatpush3.bf16.msra.mxu1 %v3343_v18 }
0x1203   :  { %2546 = vmatprep.subr.bf16.mxu1 %v2728_v8 }
0x1206   :  { %2547 = vmatpush3.bf16.msra.mxu1 %v3350_v35 }
0x1207   :  { %2548 = vmatprep.subr.bf16.mxu1 %v2728_v8 }
0x120a   :  { %2549 = vmatpush3.bf16.msra.mxu1 %v3377_v19 }
0x120b   :  { %2574 = vmatprep.subr.bf16.mxu1 %v2728_v8 }
0x12c0   :  { %v1365_v54 = vpop.f32.mrb[52].mxu1 }
0x12c1   :  { %v1366_v53 = vadd.f32 %v1365_v54, %v310_v39  ;;  %v2512_v0 = vpop.f32.mrb[53].mxu1 }
0x12c2   :  { %v1368_v1 = vpop.f32.mrb[54].mxu1 }
0x12c3   :  { %v1371_v2 = vmax.f32 %v1366_v53, 0.0  ;;  %v2513_v49 = vpop.f32.mrb[55].mxu1 }
0x12c5   :  { %v1372_v14 = vpack.c.bf16 %v1371_v2, %v1371_v2 }
0x12c7   :  { %2531 = vmatmul.mubr.bf16.vlgmr.msra.gmra.mrb[56].mxu0 %v1372_v14 }
0x12c8   :  { %2555 = vmatpush3.bf16.msra.mxu0 %v3246_v63  ;;  %2570 = vmatprep.mubr.msk.bf16.mxu0 %vm2729_vm2, %v2728_v8 }
0x12c9   :  { %2556 = vmatprep.subr.bf16.mxu0 %v2728_v8 }
0x12cc   :  { %2557 = vmatpush3.bf16.msra.mxu0 %v3275_v3 }
0x12cd   :  { %2558 = vmatprep.subr.bf16.mxu0 %v2728_v8 }
0x12d0   :  { %2559 = vmatpush3.bf16.msra.mxu0 %v3282_v56 }
0x12d1   :  { %2560 = vmatprep.subr.bf16.mxu0 %v2728_v8 }
0x12d4   :  { %2561 = vmatpush3.bf16.msra.mxu0 %v3309_v30 }
0x12d5   :  { %2562 = vmatprep.subr.bf16.mxu0 %v2728_v8 }
0x12d8   :  { %2563 = vmatpush3.bf16.msra.mxu0 %v3316_v13 }
0x12d9   :  { %2564 = vmatprep.subr.bf16.mxu0 %v2728_v8 }
0x12dc   :  { %2565 = vmatpush3.bf16.msra.mxu0 %v3343_v18 }
0x12dd   :  { %2566 = vmatprep.subr.bf16.mxu0 %v2728_v8 }
0x12e0   :  { %2567 = vmatpush3.bf16.msra.mxu0 %v3350_v35 }
0x12e1   :  { %2568 = vmatprep.subr.bf16.mxu0 %v2728_v8 }
0x12e4   :  { %2569 = vmatpush3.bf16.msra.mxu0 %v3377_v19 }
0x12e5   :  { %2594 = vmatprep.subr.bf16.mxu0 %v2728_v8 }
0x139a   :  { %v1409_v4 = vpop.f32.mrb[56].mxu0 }
0x139b   :  { %v1410_v5 = vadd.f32 %v1409_v4, %v315_v41  ;;  %v2532_v16 = vpop.f32.mrb[57].mxu0 }
0x139c   :  { %v1412_v50 = vpop.f32.mrb[58].mxu0 }
0x139d   :  { %v1415_v6 = vmax.f32 %v1410_v5, 0.0  ;;  %v2533_v9 = vpop.f32.mrb[59].mxu0 }
0x139f   :  { %v1416_v12 = vpack.c.bf16 %v1415_v6, %v1415_v6 }
0x13a1   :  { %2551 = vmatmul.mubr.bf16.vlgmr.msra.gmra.mrb[56].mxu1 %v1416_v12 }
0x13a2   :  { %2575 = vmatpush3.bf16.msra.mxu1 %v3246_v63  ;;  %2590 = vmatprep.mubr.msk.bf16.mxu1 %vm2729_vm2, %v2728_v8 }
0x13a3   :  { %2576 = vmatprep.subr.bf16.mxu1 %v2728_v8 }
0x13a6   :  { %2577 = vmatpush3.bf16.msra.mxu1 %v3275_v3 }
0x13a7   :  { %2578 = vmatprep.subr.bf16.mxu1 %v2728_v8 }
0x13aa   :  { %2579 = vmatpush3.bf16.msra.mxu1 %v3282_v56 }
0x13ab   :  { %2580 = vmatprep.subr.bf16.mxu1 %v2728_v8 }
0x13ae   :  { %2581 = vmatpush3.bf16.msra.mxu1 %v3309_v30 }
0x13af   :  { %2582 = vmatprep.subr.bf16.mxu1 %v2728_v8 }
0x13b2   :  { %2583 = vmatpush3.bf16.msra.mxu1 %v3316_v13 }
0x13b3   :  { %2584 = vmatprep.subr.bf16.mxu1 %v2728_v8 }
0x13b6   :  { %2585 = vmatpush3.bf16.msra.mxu1 %v3343_v18 }
0x13b7   :  { %2586 = vmatprep.subr.bf16.mxu1 %v2728_v8 }
0x13ba   :  { %2587 = vmatpush3.bf16.msra.mxu1 %v3350_v35 }
0x13bb   :  { %2588 = vmatprep.subr.bf16.mxu1 %v2728_v8 }
0x13be   :  { %2589 = vmatpush3.bf16.msra.mxu1 %v3377_v19 }
0x13bf   :  { %2614 = vmatprep.subr.bf16.mxu1 %v2728_v8 }
0x1474   :  { %v1453_v46 = vpop.f32.mrb[56].mxu1 }
0x1475   :  { %v1454_v15 = vadd.f32 %v1453_v46, %v318_v38  ;;  %v2552_v20 = vpop.f32.mrb[57].mxu1 }
0x1476   :  { %v1456_v52 = vpop.f32.mrb[58].mxu1 }
0x1477   :  { %v1459_v21 = vmax.f32 %v1454_v15, 0.0  ;;  %v2553_v22 = vpop.f32.mrb[59].mxu1 }
0x1479   :  { %v1460_v23 = vpack.c.bf16 %v1459_v21, %v1459_v21 }
0x147b   :  { %2571 = vmatmul.mubr.bf16.vlgmr.msra.gmra.mrb[60].mxu0 %v1460_v23 }
0x147c   :  { %2595 = vmatpush3.bf16.msra.mxu0 %v3246_v63  ;;  %2610 = vmatprep.mubr.msk.bf16.mxu0 %vm2729_vm2, %v2728_v8 }
0x147d   :  { %2596 = vmatprep.subr.bf16.mxu0 %v2728_v8 }
0x1480   :  { %2597 = vmatpush3.bf16.msra.mxu0 %v3275_v3 }
0x1481   :  { %2598 = vmatprep.subr.bf16.mxu0 %v2728_v8 }
0x1484   :  { %2599 = vmatpush3.bf16.msra.mxu0 %v3282_v56 }
0x1485   :  { %2600 = vmatprep.subr.bf16.mxu0 %v2728_v8 }
0x1488   :  { %2601 = vmatpush3.bf16.msra.mxu0 %v3309_v30 }
0x1489   :  { %2602 = vmatprep.subr.bf16.mxu0 %v2728_v8 }
0x148c   :  { %2603 = vmatpush3.bf16.msra.mxu0 %v3316_v13 }
0x148d   :  { %2604 = vmatprep.subr.bf16.mxu0 %v2728_v8 }
0x1490   :  { %2605 = vmatpush3.bf16.msra.mxu0 %v3343_v18 }
0x1491   :  { %2606 = vmatprep.subr.bf16.mxu0 %v2728_v8 }
0x1494   :  { %2607 = vmatpush3.bf16.msra.mxu0 %v3350_v35 }
0x1495   :  { %2608 = vmatprep.subr.bf16.mxu0 %v2728_v8 }
0x1498   :  { %2609 = vmatpush3.bf16.msra.mxu0 %v3377_v19 }
0x1499   :  { %2634 = vmatprep.subr.bf16.mxu0 %v2728_v8 }
0x154e   :  { %v1497_v17 = vpop.f32.mrb[60].mxu0 }
0x154f   :  { %v1498_v24 = vadd.f32 %v1497_v17, %v323_v40  ;;  %v2572_v25 = vpop.f32.mrb[61].mxu0 }
0x1550   :  { %v1500_v48 = vpop.f32.mrb[62].mxu0 }
0x1551   :  { %v1503_v27 = vmax.f32 %v1498_v24, 0.0  ;;  %v2573_v55 = vpop.f32.mrb[63].mxu0 }
0x1553   :  { %v1504_v29 = vpack.c.bf16 %v1503_v27, %v1503_v27 }
0x1555   :  { %2591 = vmatmul.mubr.bf16.vlgmr.msra.gmra.mrb[60].mxu1 %v1504_v29 }
0x1556   :  { %2615 = vmatpush3.bf16.msra.mxu1 %v3246_v63  ;;  %2630 = vmatprep.mubr.msk.bf16.mxu1 %vm2729_vm2, %v2728_v8 }
0x1557   :  { %2616 = vmatprep.subr.bf16.mxu1 %v2728_v8 }
0x155a   :  { %2617 = vmatpush3.bf16.msra.mxu1 %v3275_v3 }
0x155b   :  { %2618 = vmatprep.subr.bf16.mxu1 %v2728_v8 }
0x155e   :  { %2619 = vmatpush3.bf16.msra.mxu1 %v3282_v56 }
0x155f   :  { %2620 = vmatprep.subr.bf16.mxu1 %v2728_v8 }
0x1562   :  { %2621 = vmatpush3.bf16.msra.mxu1 %v3309_v30 }
0x1563   :  { %2622 = vmatprep.subr.bf16.mxu1 %v2728_v8 }
0x1566   :  { %2623 = vmatpush3.bf16.msra.mxu1 %v3316_v13 }
0x1567   :  { %2624 = vmatprep.subr.bf16.mxu1 %v2728_v8 }
0x156a   :  { %2625 = vmatpush3.bf16.msra.mxu1 %v3343_v18  ;;  %v2687_v18 = vld [vmem:[%s3563_s4] sm:$0xff]  }
0x156b   :  { %2626 = vmatprep.subr.bf16.mxu1 %v2728_v8 }
0x156e   :  { %2627 = vmatpush3.bf16.msra.mxu1 %v3350_v35  ;;  %v2689_v35 = vld [vmem:[%s3563_s4 + $0x10] sm:$0xff]  }
0x156f   :  { %2628 = vmatprep.subr.bf16.mxu1 %v2728_v8 }
0x1572   :  { %2629 = vmatpush3.bf16.msra.mxu1 %v3377_v19  ;;  %v2690_v19 = vld [vmem:[%s3563_s4 + $0x18] sm:$0xff]   ;;  %s2704_s4 = scalar_lea.vmem %s1739_s29, 128 }
0x1573   :  { %p2705_p0 = scmp.ne.s32.totalorder %s1739_s29, %s2704_s4  ;;  %p2710_p2 = scmp.lt.s32.totalorder %s2704_s4, %s2704_s4 }
0x1575   :  { %p2711_p3 = por %p2710_p2, %p2709_p1 }
0x1577   :  { %p2712_p4 = pnand %p2711_p3, %p2705_p0 }
0x1628   :  { %v1541_v63 = vpop.f32.mrb[60].mxu1 }
0x1629   :  { %v1542_v3 = vadd.f32 %v1541_v63, %v326_v43  ;;  %v2592_v56 = vpop.f32.mrb[61].mxu1 }
0x162a   :  { %v1544_v30 = vpop.f32.mrb[62].mxu1 }
0x162b   :  { %v1547_v13 = vmax.f32 %v1542_v3, 0.0  ;;  %v2593_v31 = vpop.f32.mrb[63].mxu1 }
0x162d   :  { %v1548_v32 = vpack.c.bf16 %v1547_v13, %v1547_v13 }
0x162f   :  { %2611 = vmatmul.mubr.bf16.vlgmr.msra.gmra.mrb[64].mxu0 %v1548_v32 }
0x1630   :  { %2650 = vmatprep.mubr.msk.bf16.mxu0 %vm2729_vm2, %v2728_v8  ;;  %2635 = vmatpush3.bf16.msra.mxu0 %v2687_v18 }
0x1631   :  { %2636 = vmatprep.subr.bf16.mxu0 %v2728_v8 }
0x1634   :  { %2637 = vmatpush3.bf16.msra.mxu0 %v2688_v45 }
0x1635   :  { %2638 = vmatprep.subr.bf16.mxu0 %v2728_v8 }
0x1638   :  { %2639 = vmatpush3.bf16.msra.mxu0 %v2689_v35 }
0x1639   :  { %2640 = vmatprep.subr.bf16.mxu0 %v2728_v8 }
0x163c   :  { %2641 = vmatpush3.bf16.msra.mxu0 %v2690_v19 }
0x163d   :  { %2642 = vmatprep.subr.bf16.mxu0 %v2728_v8 }
0x1640   :  { %2643 = vmatpush3.bf16.msra.mxu0 %v2691_v28 }
0x1641   :  { %2644 = vmatprep.subr.bf16.mxu0 %v2728_v8 }
0x1644   :  { %2645 = vmatpush3.bf16.msra.mxu0 %v2692_v34 }
0x1645   :  { %2646 = vmatprep.subr.bf16.mxu0 %v2728_v8 }
0x1648   :  { %2647 = vmatpush3.bf16.msra.mxu0 %v2693_v47 }
0x1649   :  { %2648 = vmatprep.subr.bf16.mxu0 %v2728_v8  ;;  %v1785_v8 = vld [vmem:[%s3564_s5] ss:$0 sm:$0xff] }
0x164c   :  { %2649 = vmatpush3.bf16.msra.mxu0 %v2694_v60 }
0x1702   :  { %v1585_v37 = vpop.f32.mrb[64].mxu0 }
0x1703   :  { %v1586_v51 = vadd.f32 %v1585_v37, %v331_v36  ;;  %v2612_v7 = vpop.f32.mrb[65].mxu0 }
0x1704   :  { %v1588_v57 = vpop.f32.mrb[66].mxu0 }
0x1705   :  { %v1591_v58 = vmax.f32 %v1586_v51, 0.0  ;;  %v2613_v33 = vpop.f32.mrb[67].mxu0 }
0x1707   :  { %v1592_v59 = vpack.c.bf16 %v1591_v58, %v1591_v58 }
0x1709   :  { %2631 = vmatmul.mubr.bf16.vlgmr.msra.gmra.mrb[64].mxu1 %v1592_v59 }
0x17dc   :  { %v1629_v61 = vpop.f32.mrb[64].mxu1 }
0x17dd   :  { %v1630_v62 = vadd.f32 %v1629_v61, %v334_v42  ;;  %v2632_v10 = vpop.f32.mrb[65].mxu1 }
0x17de   :  { %v1632_v11 = vpop.f32.mrb[66].mxu1 }
0x17df   :  { %v1635_v39 = vmax.f32 %v1630_v62, 0.0  ;;  %v2633_v54 = vpop.f32.mrb[67].mxu1 }
0x17e1   :  { %v1636_v53 = vpack.c.bf16 %v1635_v39, %v1635_v39 }
0x17e3   :  { %2651 = vmatmul.mubr.bf16.vlgmr.msra.gmra.mrb[68].mxu0 %v1636_v53 }
0x18b6   :  { %v1725_v0 = vpop.f32.mrb[68].mxu0 }
0x18b7   :  { %v1726_v1 = vadd.f32 %v1785_v8, %v1725_v0  ;;  %v2652_v2 = vpop.f32.mrb[69].mxu0 }
0x18b8   :  { %v1728_v49 = vpop.f32.mrb[70].mxu0 }
0x18b9   :  { %1731 = vst [vmem:[#allocation3] sm:$0xff] %v1726_v1  ;;  %v2653_v44 = vpop.f32.mrb[71].mxu0 }
0x18ba   :  { %2715 = shalt.err (!%p2712_p4)
}
0x18bb   :  { %s2716_s5 = scalar_lea.hbm %s3565_s6, 128 }
0x18bc   :  { %p2717_p5 = scmp.ne.s32.totalorder %s3565_s6, %s2716_s5  ;;  %p2720_p6 = scmp.lt.u32.totalorder %s2716_s5, %s3565_s6 }
0x18be   :  { %p2722_p7 = pnand %p2720_p6, %p2717_p5 }
0x18c0   :  { %2725 = shalt.err (!%p2722_p7)
}
0x18c1   :  { %1741 = dma.vmem_to_hbm [thread:$0]  %s1739_s29, 128, %s3565_s6, [#allocation4]  }
0x18c2   :  { %2726 = dma.done.wait [#allocation4], 128  }
0x18c3   :  { %2727 = vsyncadd [#allocation4], 4294967168 }
0x18c4   :  { %1745 = vsyncpa [#allocation4], 1 }

</bundles_post_ra>
